<compile_context>
chip_gen: v7x
topology: tpu7x:2x2x1
jax: 0.10.0
libtpu: 0.0.40
codegen_flags: <defaults>
</compile_context>

<pallas_src>
import jax
import jax.numpy as jnp
from jax.experimental import pallas as pl
from jax.experimental.pallas import tpu as pltpu

D_IN, D1, D2, D3, D4 = 160, 512, 256, 128, 17384
TILE_N = 2048                                       # lane-dense, multiple of 512
D4_PAD = ((D4 + TILE_N - 1) // TILE_N) * TILE_N     # 18432 = 9 * 2048
MAX_TILE_B = 128
PAD_BIAS = -1e30                                    # exp() underflows to exactly 0 in f32


def _round_up(x, m):
    return ((x + m - 1) // m) * m


def mlp_logsoftmax_kernel(x_ref, w1_ref, b1_ref, w2_ref, b2_ref,
                          w3_ref, b3_ref, w4_ref, b4_ref,
                          logits_ref, lse_ref,
                          h3_ref, m_ref, l_ref):
    n = pl.program_id(1)

    # First N-tile of each batch tile: run fc1-fc3 once, reset online-softmax state.
    @pl.when(n == 0)
    def _():
        h = jnp.dot(x_ref[...], w1_ref[...], preferred_element_type=jnp.float32)
        h = jnp.maximum(h + b1_ref[...], 0.0)
        h = jnp.dot(h, w2_ref[...], preferred_element_type=jnp.float32)
        h = jnp.maximum(h + b2_ref[...], 0.0)
        h = jnp.dot(h, w3_ref[...], preferred_element_type=jnp.float32)
        h3_ref[...] = jnp.maximum(h + b3_ref[...], 0.0)
        m_ref[...] = jnp.full_like(m_ref, -jnp.inf)
        l_ref[...] = jnp.zeros_like(l_ref)

    # fc4 tile: (TILE_B, 128) @ (128, TILE_N)
    logits = jnp.dot(h3_ref[...], w4_ref[...], preferred_element_type=jnp.float32)
    logits = logits + b4_ref[...]
    logits_ref[...] = logits

    # Online log-sum-exp update over the streamed N tiles.
    m_prev = m_ref[...]
    m_new = jnp.maximum(m_prev, jnp.max(logits, axis=1, keepdims=True))
    alpha = jnp.exp(m_prev - m_new)                       # 0 on the first tile (m_prev=-inf)
    l_ref[...] = alpha * l_ref[...] + jnp.sum(jnp.exp(logits - m_new), axis=1, keepdims=True)
    m_ref[...] = m_new

    @pl.when(n == pl.num_programs(1) - 1)
    def _():
        lse_ref[...] = m_ref[...] + jnp.log(l_ref[...])


@jax.jit
def net_forward(x, params):
    """x: (batch, ...) flattened to (batch, 160). Returns (batch, 17384) log-probs."""
    batch = x.shape[0]
    x2d = x.reshape(batch, -1).astype(jnp.float32)
    w1, b1, w2, b2, w3, b3, w4, b4 = params

    tile_b = min(MAX_TILE_B, _round_up(batch, 8))
    b_pad = _round_up(batch, tile_b)
    if b_pad != batch:
        x2d = jnp.pad(x2d, ((0, b_pad - batch), (0, 0)))

    grid = (b_pad // tile_b, D4_PAD // TILE_N)
    resident = lambda b, n: (0, 0)  # fc1-fc3 params: loaded once, stay in VMEM

    logits_pad, lse = pl.pallas_call(
        mlp_logsoftmax_kernel,
        grid=grid,
        in_specs=[
            pl.BlockSpec((tile_b, D_IN), lambda b, n: (b, 0)),   # x
            pl.BlockSpec((D_IN, D1), resident),                  # w1
            pl.BlockSpec((1, D1), resident),                     # b1
            pl.BlockSpec((D1, D2), resident),                    # w2
            pl.BlockSpec((1, D2), resident),                     # b2
            pl.BlockSpec((D2, D3), resident),                    # w3
            pl.BlockSpec((1, D3), resident),                     # b3
            pl.BlockSpec((D3, TILE_N), lambda b, n: (0, n)),     # w4 (streamed)
            pl.BlockSpec((1, TILE_N), lambda b, n: (0, n)),      # b4 (streamed)
        ],
        out_specs=[
            pl.BlockSpec((tile_b, TILE_N), lambda b, n: (b, n)),  # raw biased logits
            pl.BlockSpec((tile_b, 1), lambda b, n: (b, 0)),       # lse per row
        ],
        out_shape=[
            jax.ShapeDtypeStruct((b_pad, D4_PAD), jnp.float32),
            jax.ShapeDtypeStruct((b_pad, 1), jnp.float32),
        ],
        scratch_shapes=[
            pltpu.VMEM((tile_b, D3), jnp.float32),  # h3 (fc3 output, reused per N tile)
            pltpu.VMEM((tile_b, 1), jnp.float32),   # running max m
            pltpu.VMEM((tile_b, 1), jnp.float32),   # running sum-of-exp l
        ],
        compiler_params=pltpu.CompilerParams(
            dimension_semantics=("parallel", "arbitrary"),
            vmem_limit_bytes=48 << 20,  # fits v7x's 64 MiB physical VMEM
        ),
    )(x2d, w1, b1, w2, b2, w3, b3, w4, b4)

    # Final log-softmax subtraction fused by XLA with the un-padding slice.
    return logits_pad[:batch, :D4] - lse[:batch]


def init_params(key):
    """Deterministic PyTorch-Linear-style init: U(-1/sqrt(fan_in), 1/sqrt(fan_in)).

    Weights are returned already transposed to (in, out); fc4 is padded along
    the output dim to D4_PAD (zero weights, -1e30 bias for padding columns).
    """
    dims = [(D_IN, D1), (D1, D2), (D2, D3), (D3, D4)]
    keys = jax.random.split(key, 2 * len(dims))
    params = []
    for i, (fin, fout) in enumerate(dims):
        bound = 1.0 / jnp.sqrt(jnp.float32(fin))
        w = jax.random.uniform(keys[2 * i], (fin, fout), jnp.float32, -bound, bound)
        b = jax.random.uniform(keys[2 * i + 1], (1, fout), jnp.float32, -bound, bound)
        if fout == D4:  # pad fc4 outputs to a multiple of TILE_N
            w = jnp.pad(w, ((0, 0), (0, D4_PAD - D4)))
            b = jnp.pad(b, ((0, 0), (0, D4_PAD - D4)), constant_values=PAD_BIAS)
        params += [w, b]
    return tuple(params)


def reference_forward(x, params):
    """Pure-JAX reference mirroring the PyTorch forward."""
    w1, b1, w2, b2, w3, b3, w4, b4 = params
    h = x.reshape(x.shape[0], -1).astype(jnp.float32)
    h = jnp.maximum(h @ w1 + b1, 0.0)
    h = jnp.maximum(h @ w2 + b2, 0.0)
    h = jnp.maximum(h @ w3 + b3, 0.0)
    logits = (h @ w4 + b4)[:, :D4]
    return jax.nn.log_softmax(logits, axis=1)


if __name__ == "__main__":
    key = jax.random.PRNGKey(0)
    pkey, xkey = jax.random.split(key)
    params = init_params(pkey)

    batch = 8
    x = jax.random.normal(xkey, (batch, D_IN), jnp.float32)  # flattened input (160 feats)

    out = net_forward(x, params)
    out = jax.block_until_ready(out)

    ref = reference_forward(x, params)
    assert out.shape == (batch, D4), out.shape
    assert jnp.allclose(out, ref, atol=1e-4, rtol=1e-4), float(jnp.max(jnp.abs(out - ref)))

    print("KERNEL_OK")
</pallas_src>

<mosaic_0001>
module attributes {stable_mosaic.version = 11 : i64} {
  func.func @mlp_logsoftmax_kernel(%arg0: i32, %arg1: i32, %arg2: memref<8x160xf32, #tpu.memory_space<vmem>>, %arg3: memref<160x512xf32, #tpu.memory_space<vmem>>, %arg4: memref<1x512xf32, #tpu.memory_space<vmem>>, %arg5: memref<512x256xf32, #tpu.memory_space<vmem>>, %arg6: memref<1x256xf32, #tpu.memory_space<vmem>>, %arg7: memref<256x128xf32, #tpu.memory_space<vmem>>, %arg8: memref<1x128xf32, #tpu.memory_space<vmem>>, %arg9: memref<128x2048xf32, #tpu.memory_space<vmem>>, %arg10: memref<1x2048xf32, #tpu.memory_space<vmem>>, %arg11: memref<8x2048xf32, #tpu.memory_space<vmem>>, %arg12: memref<8x1xf32, #tpu.memory_space<vmem>>, %arg13: memref<8x128xf32, #tpu.memory_space<vmem>>, %arg14: memref<8x1xf32, #tpu.memory_space<vmem>>, %arg15: memref<8x1xf32, #tpu.memory_space<vmem>>) attributes {dimension_semantics = [#tpu.dimension_semantics<parallel>, #tpu.dimension_semantics<arbitrary>], iteration_bounds = array<i64: 1, 9>, scalar_prefetch = 0 : i64, scratch_operands = 3 : i64, tpu.core_type = #tpu.core_type<tc>, window_params = [{transform_indices = @transform_0, window_bounds = array<i64: 8, 160>}, {pipeline_mode = #tpu.pipeline_mode<synchronous>, transform_indices = @transform_1, window_bounds = array<i64: 160, 512>}, {pipeline_mode = #tpu.pipeline_mode<synchronous>, transform_indices = @transform_2, window_bounds = array<i64: 1, 512>}, {pipeline_mode = #tpu.pipeline_mode<synchronous>, transform_indices = @transform_3, window_bounds = array<i64: 512, 256>}, {pipeline_mode = #tpu.pipeline_mode<synchronous>, transform_indices = @transform_4, window_bounds = array<i64: 1, 256>}, {pipeline_mode = #tpu.pipeline_mode<synchronous>, transform_indices = @transform_5, window_bounds = array<i64: 256, 128>}, {pipeline_mode = #tpu.pipeline_mode<synchronous>, transform_indices = @transform_6, window_bounds = array<i64: 1, 128>}, {transform_indices = @transform_7, window_bounds = array<i64: 128, 2048>}, {transform_indices = @transform_8, window_bounds = array<i64: 1, 2048>}, {transform_indices = @transform_9, window_bounds = array<i64: 8, 2048>}, {transform_indices = @transform_10, window_bounds = array<i64: 8, 1>}]} {
    %c0_i32 = arith.constant 0 : i32
    %0 = arith.cmpi eq, %arg1, %c0_i32 : i32
    %1 = arith.extui %0 : i1 to i32
    %c0_i32_0 = arith.constant 0 : i32
    %2 = arith.cmpi ne, %1, %c0_i32_0 : i32
    scf.if %2 {
      %c0_19 = arith.constant 0 : index
      %c0_20 = arith.constant 0 : index
      %29 = vector.load %arg2[%c0_19, %c0_20] : memref<8x160xf32, #tpu.memory_space<vmem>>, vector<8x160xf32>
      %c0_21 = arith.constant 0 : index
      %c0_22 = arith.constant 0 : index
      %30 = vector.load %arg3[%c0_21, %c0_22] : memref<160x512xf32, #tpu.memory_space<vmem>>, vector<160x512xf32>
      %cst_23 = arith.constant dense<0.000000e+00> : vector<8x512xf32>
      %31 = tpu.matmul %29, %30, %cst_23 {dimension_numbers = #tpu.dot_dimension_numbers<[1], [0], [0], [1], [0, 0, 1, 1], [], []>} : vector<8x160xf32>, vector<160x512xf32>, vector<8x512xf32> -> vector<8x512xf32>
      %c0_24 = arith.constant 0 : index
      %c0_25 = arith.constant 0 : index
      %32 = vector.load %arg4[%c0_24, %c0_25] : memref<1x512xf32, #tpu.memory_space<vmem>>, vector<1x512xf32>
      %33 = vector.broadcast %32 : vector<1x512xf32> to vector<8x512xf32>
      %34 = arith.addf %31, %33 : vector<8x512xf32>
      %cst_26 = arith.constant 0.000000e+00 : f32
      %35 = vector.broadcast %cst_26 : f32 to vector<8x512xf32>
      %36 = arith.maximumf %34, %35 : vector<8x512xf32>
      %c0_27 = arith.constant 0 : index
      %c0_28 = arith.constant 0 : index
      %37 = vector.load %arg5[%c0_27, %c0_28] : memref<512x256xf32, #tpu.memory_space<vmem>>, vector<512x256xf32>
      %cst_29 = arith.constant dense<0.000000e+00> : vector<8x256xf32>
      %38 = tpu.matmul %36, %37, %cst_29 {dimension_numbers = #tpu.dot_dimension_numbers<[1], [0], [0], [1], [0, 0, 1, 1], [], []>} : vector<8x512xf32>, vector<512x256xf32>, vector<8x256xf32> -> vector<8x256xf32>
      %c0_30 = arith.constant 0 : index
      %c0_31 = arith.constant 0 : index
      %39 = vector.load %arg6[%c0_30, %c0_31] : memref<1x256xf32, #tpu.memory_space<vmem>>, vector<1x256xf32>
      %40 = vector.broadcast %39 : vector<1x256xf32> to vector<8x256xf32>
      %41 = arith.addf %38, %40 : vector<8x256xf32>
      %cst_32 = arith.constant 0.000000e+00 : f32
      %42 = vector.broadcast %cst_32 : f32 to vector<8x256xf32>
      %43 = arith.maximumf %41, %42 : vector<8x256xf32>
      %c0_33 = arith.constant 0 : index
      %c0_34 = arith.constant 0 : index
      %44 = vector.load %arg7[%c0_33, %c0_34] : memref<256x128xf32, #tpu.memory_space<vmem>>, vector<256x128xf32>
      %cst_35 = arith.constant dense<0.000000e+00> : vector<8x128xf32>
      %45 = tpu.matmul %43, %44, %cst_35 {dimension_numbers = #tpu.dot_dimension_numbers<[1], [0], [0], [1], [0, 0, 1, 1], [], []>} : vector<8x256xf32>, vector<256x128xf32>, vector<8x128xf32> -> vector<8x128xf32>
      %c0_36 = arith.constant 0 : index
      %c0_37 = arith.constant 0 : index
      %46 = vector.load %arg8[%c0_36, %c0_37] : memref<1x128xf32, #tpu.memory_space<vmem>>, vector<1x128xf32>
      %47 = vector.broadcast %46 : vector<1x128xf32> to vector<8x128xf32>
      %48 = arith.addf %45, %47 : vector<8x128xf32>
      %cst_38 = arith.constant 0.000000e+00 : f32
      %49 = vector.broadcast %cst_38 : f32 to vector<8x128xf32>
      %50 = arith.maximumf %48, %49 : vector<8x128xf32>
      %c0_39 = arith.constant 0 : index
      %c0_40 = arith.constant 0 : index
      %51 = vector.load %arg13[%c0_39, %c0_40] : memref<8x128xf32, #tpu.memory_space<vmem>>, vector<8x128xf32>
      tpu.vector_store %arg13[%c0_39, %c0_40], %50 {strides = array<i32>} : memref<8x128xf32, #tpu.memory_space<vmem>>, vector<8x128xf32>,
      %cst_41 = arith.constant 0xFF800000 : f32
      %52 = vector.broadcast %cst_41 : f32 to vector<8x1xf32>
      %c0_42 = arith.constant 0 : index
      %c0_43 = arith.constant 0 : index
      %53 = vector.load %arg14[%c0_42, %c0_43] : memref<8x1xf32, #tpu.memory_space<vmem>>, vector<8x1xf32>
      tpu.vector_store %arg14[%c0_42, %c0_43], %52 {strides = array<i32>} : memref<8x1xf32, #tpu.memory_space<vmem>>, vector<8x1xf32>,
      %cst_44 = arith.constant 0.000000e+00 : f32
      %54 = vector.broadcast %cst_44 : f32 to vector<8x1xf32>
      %c0_45 = arith.constant 0 : index
      %c0_46 = arith.constant 0 : index
      %55 = vector.load %arg15[%c0_45, %c0_46] : memref<8x1xf32, #tpu.memory_space<vmem>>, vector<8x1xf32>
      tpu.vector_store %arg15[%c0_45, %c0_46], %54 {strides = array<i32>} : memref<8x1xf32, #tpu.memory_space<vmem>>, vector<8x1xf32>,
    } else {
    }
    %c0 = arith.constant 0 : index
    %c0_1 = arith.constant 0 : index
    %3 = vector.load %arg13[%c0, %c0_1] : memref<8x128xf32, #tpu.memory_space<vmem>>, vector<8x128xf32>
    %c0_2 = arith.constant 0 : index
    %c0_3 = arith.constant 0 : index
    %4 = vector.load %arg9[%c0_2, %c0_3] : memref<128x2048xf32, #tpu.memory_space<vmem>>, vector<128x2048xf32>
    %cst = arith.constant dense<0.000000e+00> : vector<8x2048xf32>
    %5 = tpu.matmul %3, %4, %cst {dimension_numbers = #tpu.dot_dimension_numbers<[1], [0], [0], [1], [0, 0, 1, 1], [], []>} : vector<8x128xf32>, vector<128x2048xf32>, vector<8x2048xf32> -> vector<8x2048xf32>
    %c0_4 = arith.constant 0 : index
    %c0_5 = arith.constant 0 : index
    %6 = vector.load %arg10[%c0_4, %c0_5] : memref<1x2048xf32, #tpu.memory_space<vmem>>, vector<1x2048xf32>
    %7 = vector.broadcast %6 : vector<1x2048xf32> to vector<8x2048xf32>
    %8 = arith.addf %5, %7 : vector<8x2048xf32>
    %c0_6 = arith.constant 0 : index
    %c0_7 = arith.constant 0 : index
    %9 = vector.load %arg11[%c0_6, %c0_7] : memref<8x2048xf32, #tpu.memory_space<vmem>>, vector<8x2048xf32>
    tpu.vector_store %arg11[%c0_6, %c0_7], %8 {strides = array<i32>} : memref<8x2048xf32, #tpu.memory_space<vmem>>, vector<8x2048xf32>,
    %c0_8 = arith.constant 0 : index
    %c0_9 = arith.constant 0 : index
    %10 = vector.load %arg14[%c0_8, %c0_9] : memref<8x1xf32, #tpu.memory_space<vmem>>, vector<8x1xf32>
    %cst_10 = arith.constant dense<0xFF800000> : vector<8xf32>
    %11 = vector.multi_reduction <maximumf>, %8, %cst_10 [1] : vector<8x2048xf32> to vector<8xf32>
    %12 = vector.shape_cast %11 : vector<8xf32> to vector<8x1xf32>
    %13 = arith.maximumf %10, %12 : vector<8x1xf32>
    %14 = arith.subf %10, %13 : vector<8x1xf32>
    %15 = math.exp %14 : vector<8x1xf32>
    %c0_11 = arith.constant 0 : index
    %c0_12 = arith.constant 0 : index
    %16 = vector.load %arg15[%c0_11, %c0_12] : memref<8x1xf32, #tpu.memory_space<vmem>>, vector<8x1xf32>
    %17 = arith.mulf %15, %16 : vector<8x1xf32>
    %18 = vector.broadcast %13 : vector<8x1xf32> to vector<8x2048xf32>
    %19 = arith.subf %8, %18 : vector<8x2048xf32>
    %20 = math.exp %19 : vector<8x2048xf32>
    %cst_13 = arith.constant dense<0.000000e+00> : vector<8xf32>
    %21 = vector.multi_reduction <add>, %20, %cst_13 [1] : vector<8x2048xf32> to vector<8xf32>
    %22 = vector.shape_cast %21 : vector<8xf32> to vector<8x1xf32>
    %23 = arith.addf %17, %22 : vector<8x1xf32>
    %c0_14 = arith.constant 0 : index
    %c0_15 = arith.constant 0 : index
    %24 = vector.load %arg15[%c0_14, %c0_15] : memref<8x1xf32, #tpu.memory_space<vmem>>, vector<8x1xf32>
    tpu.vector_store %arg15[%c0_14, %c0_15], %23 {strides = array<i32>} : memref<8x1xf32, #tpu.memory_space<vmem>>, vector<8x1xf32>,
    %c0_16 = arith.constant 0 : index
    %c0_17 = arith.constant 0 : index
    %25 = vector.load %arg14[%c0_16, %c0_17] : memref<8x1xf32, #tpu.memory_space<vmem>>, vector<8x1xf32>
    tpu.vector_store %arg14[%c0_16, %c0_17], %13 {strides = array<i32>} : memref<8x1xf32, #tpu.memory_space<vmem>>, vector<8x1xf32>,
    %c8_i32 = arith.constant 8 : i32
    %26 = arith.cmpi eq, %arg1, %c8_i32 : i32
    %27 = arith.extui %26 : i1 to i32
    %c0_i32_18 = arith.constant 0 : i32
    %28 = arith.cmpi ne, %27, %c0_i32_18 : i32
    scf.if %28 {
      %c0_19 = arith.constant 0 : index
      %c0_20 = arith.constant 0 : index
      %29 = vector.load %arg14[%c0_19, %c0_20] : memref<8x1xf32, #tpu.memory_space<vmem>>, vector<8x1xf32>
      %c0_21 = arith.constant 0 : index
      %c0_22 = arith.constant 0 : index
      %30 = vector.load %arg15[%c0_21, %c0_22] : memref<8x1xf32, #tpu.memory_space<vmem>>, vector<8x1xf32>
      %31 = math.log %30 : vector<8x1xf32>
      %32 = arith.addf %29, %31 : vector<8x1xf32>
      %c0_23 = arith.constant 0 : index
      %c0_24 = arith.constant 0 : index
      %33 = vector.load %arg12[%c0_23, %c0_24] : memref<8x1xf32, #tpu.memory_space<vmem>>, vector<8x1xf32>
      tpu.vector_store %arg12[%c0_23, %c0_24], %32 {strides = array<i32>} : memref<8x1xf32, #tpu.memory_space<vmem>>, vector<8x1xf32>,
    } else {
    }
    return
  }
  func.func @transform_0(%arg0: i32, %arg1: i32) -> (i32, i32) {
    %c0_i32 = arith.constant 0 : i32
    %c0_i32_0 = arith.constant 0 : i32
    return %arg0, %c0_i32 : i32, i32
  }
  func.func @transform_1(%arg0: i32, %arg1: i32) -> (i32, i32) {
    %c0_i32 = arith.constant 0 : i32
    %c0_i32_0 = arith.constant 0 : i32
    %c0_i32_1 = arith.constant 0 : i32
    return %c0_i32, %c0_i32_0 : i32, i32
  }
  func.func @transform_2(%arg0: i32, %arg1: i32) -> (i32, i32) {
    %c0_i32 = arith.constant 0 : i32
    %c0_i32_0 = arith.constant 0 : i32
    %c0_i32_1 = arith.constant 0 : i32
    return %c0_i32, %c0_i32_0 : i32, i32
  }
  func.func @transform_3(%arg0: i32, %arg1: i32) -> (i32, i32) {
    %c0_i32 = arith.constant 0 : i32
    %c0_i32_0 = arith.constant 0 : i32
    %c0_i32_1 = arith.constant 0 : i32
    return %c0_i32, %c0_i32_0 : i32, i32
  }
  func.func @transform_4(%arg0: i32, %arg1: i32) -> (i32, i32) {
    %c0_i32 = arith.constant 0 : i32
    %c0_i32_0 = arith.constant 0 : i32
    %c0_i32_1 = arith.constant 0 : i32
    return %c0_i32, %c0_i32_0 : i32, i32
  }
  func.func @transform_5(%arg0: i32, %arg1: i32) -> (i32, i32) {
    %c0_i32 = arith.constant 0 : i32
    %c0_i32_0 = arith.constant 0 : i32
    %c0_i32_1 = arith.constant 0 : i32
    return %c0_i32, %c0_i32_0 : i32, i32
  }
  func.func @transform_6(%arg0: i32, %arg1: i32) -> (i32, i32) {
    %c0_i32 = arith.constant 0 : i32
    %c0_i32_0 = arith.constant 0 : i32
    %c0_i32_1 = arith.constant 0 : i32
    return %c0_i32, %c0_i32_0 : i32, i32
  }
  func.func @transform_7(%arg0: i32, %arg1: i32) -> (i32, i32) {
    %c0_i32 = arith.constant 0 : i32
    %c0_i32_0 = arith.constant 0 : i32
    return %c0_i32, %arg1 : i32, i32
  }
  func.func @transform_8(%arg0: i32, %arg1: i32) -> (i32, i32) {
    %c0_i32 = arith.constant 0 : i32
    %c0_i32_0 = arith.constant 0 : i32
    return %c0_i32, %arg1 : i32, i32
  }
  func.func @transform_9(%arg0: i32, %arg1: i32) -> (i32, i32) {
    %c0_i32 = arith.constant 0 : i32
    return %arg0, %arg1 : i32, i32
  }
  func.func @transform_10(%arg0: i32, %arg1: i32) -> (i32, i32) {
    %c0_i32 = arith.constant 0 : i32
    %c0_i32_0 = arith.constant 0 : i32
    return %arg0, %c0_i32 : i32, i32
  }
}

</mosaic_0001>

<bundles_post_ra>
// kernel: net_forward.1
= control target key start
LH: loop header
LB: loop body
LE: loop exit
PB: predicated region body
PF: predicated region fallthrough
CT: control target
= control target key end

     0   :  { %s4397_s0 = inlined_call_operand.hbm [shape: f32[8,160], index: 0, kind: input, shape index: {}]   ;;  %s4398_s1 = inlined_call_operand.hbm [shape: f32[160,512], index: 1, kind: input, shape index: {}]   ;;  %s4399_s2 = inlined_call_operand.hbm [shape: f32[1,512], index: 2, kind: input, shape index: {}]   ;;  %s4400_s3 = inlined_call_operand.hbm [shape: f32[512,256], index: 3, kind: input, shape index: {}]   ;;  %s4401_s4 = inlined_call_operand.hbm [shape: f32[1,256], index: 4, kind: input, shape index: {}]   ;;  %s4402_s5 = inlined_call_operand.hbm [shape: f32[256,128], index: 5, kind: input, shape index: {}]   ;;  %s4403_s6 = inlined_call_operand.hbm [shape: f32[1,128], index: 6, kind: input, shape index: {}]   ;;  %s4404_s7 = inlined_call_operand.hbm [shape: f32[128,18432], index: 7, kind: input, shape index: {}]   ;;  %s4405_s8 = inlined_call_operand.hbm [shape: f32[1,18432], index: 8, kind: input, shape index: {}]   ;;  %s4406_s9 = inlined_call_operand.vmem [shape: f32[8,18432], index: 9, kind: output, shape index: {0}]   ;;  %s4407_s10 = inlined_call_operand.vmem [shape: f32[8,1], index: 10, kind: output, shape index: {1}]  }
   0x1   :  { %4422 = sst [smem:[#allocation28_spill]] %s4398_s1 }
   0x2   :  { %4423 = sst [smem:[#allocation29_spill]] %s4400_s3 }
   0x3   :  { %4424 = sst [smem:[#allocation30_spill]] %s4402_s5 }
   0x4   :  { %4425 = sst [smem:[#allocation31_spill]] %s4404_s7 }
   0x5   :  { %4426 = sst [smem:[#allocation32_spill]] %s4406_s9 }
   0x6   :  { %4427 = sst [smem:[#allocation33_spill]] %s4407_s10 }
   0x7   :  { %16 = vsyncpa [#allocation6], 0 }
   0x8   :  { %17 = vsyncpa [#allocation8], 0 }
   0x9   :  { %18 = vsyncpa [#allocation11], 0 }
   0xa   :  { %19 = vsyncpa [#allocation14], 0 }
   0xb   :  { %20 = vsyncpa [#allocation17], 0 }
   0xc   :  { %22 = vsyncpa [#allocation17 + $0x1], 0  ;;  %s3607_s13 = smov 0   ;;  %s3609_s14 = smov 0  }
   0xd   :  { %s3611_s15 = smov 0   ;;  %s3613_s16 = smov 0  }
   0xe   :  { %s3615_s17 = smov 0   ;;  %s3617_s18 = smov 0  }
   0xf LB: > { %4428 = sst [smem:[#allocation24_spill]] %s3521_s16  ;;  %s3531_s19 = smov [#allocation7]   ;;  %s3529_s18 = sphi %s3617_s18, %s28_s18   ;;  %s3525_s17 = sphi %s3615_s17, %s4464_s17   ;;  %s3521_s16 = sphi %s3613_s16, %s4463_s16   ;;  %s3517_s15 = sphi %s3611_s15, %s4462_s15   ;;  %s3513_s14 = sphi %s3609_s14, %s4461_s14   ;;  %s3509_s13 = sphi %s3607_s13, %s4460_s13  }
  0x10   : > { %s329_s20 = sshll.u32 %s3531_s19, 4  ;;  %s4408_s21 = sadd.s32 4294967295, %s3529_s18   ;;  %s3646_s20 = int_to_ptr.vmem [resolvable:$true] %s329_s20 }
  0x11   : > { %p2455_p0 = scmp.ge.s32.totalorder %s3529_s18, 1  ;;  %p3641_p1 = scmp.eq.s32.totalorder %s4408_s21, 0 }
  0x12   : > { %p303_p2 = scmp.lt.s32.totalorder %s3529_s18, 10  ;;  %s3532_s24 = smov [#allocation10]  }
  0x13   : > { %s4429_s22 = scalar_select %p3641_p1, 1, 0 }
  0x14   : > { %p3648_p3 = pnand %p2455_p0, %p303_p2  ;;  %s353_s25 = sshll.u32 %s3532_s24, 4  ;;  %s3660_s25 = int_to_ptr.vmem [resolvable:$true] %s353_s25 }
  0x15   : > { %s3533_s27 = smov [#allocation13]   ;;  %s4433_s1 = sld [smem:[#allocation28_spill]] }
  0x16   : > { %s4430_s23 = scalar_select %p3648_p3, 1, 0 }
  0x17   : > { %p3059_p4 = pneg %p3648_p3  ;;  %s3662_s28 = sshll.u32 %s3533_s27, 4  ;;  %s378_s28 = int_to_ptr.vmem [resolvable:$true] %s3662_s28 }
  0x18   : > { %4431 = sst [smem:[#allocation25_spill]] %s4430_s23 }
  0x19   : > { %p3656_p5 = pnand %p3059_p4, %p3641_p1 }
  0x1b   : > { %s4432_s26 = scalar_select %p3656_p5, 1, 0 }
  0x1c   : > { %s3207_s11 = scalar_lea.hbm %s4433_s1, 10240  ;;  %p3672_p7 = pneg %p3656_p5 }
  0x1d   : > { %p3208_p6 = scmp.ne.s32.totalorder %s4433_s1, %s3207_s11  ;;  %p3214_p10 = scmp.lt.u32.totalorder %s3207_s11, %s4433_s1 }
  0x1f   : > { %p3210_p8 = pnand %p3672_p7, %p3208_p6 }
  0x21   : > { %p3211_p9 = pneg %p3210_p8 }
  0x23   : > { %p3216_p11 = pnand %p3214_p10, %p3211_p9 }
  0x25   : > { %3219 = shalt.err (!%p3216_p11)
}
  0x26   : > { %s3220_s29 = scalar_lea.vmem %s3646_s20, 10240  ;;  %p3228_p2 = scmp.lt.s32.totalorder %s3646_s20, %s3646_s20 }
  0x27   : > { %p3221_p12 = scmp.ne.s32.totalorder %s3646_s20, %s3220_s29  ;;  %p3229_p4 = scmp.lt.s32.totalorder %s3220_s29, %s3220_s29 }
  0x29   : > { %p3223_p13 = pnand %p3221_p12, %p3672_p7  ;;  %p3230_p6 = por %p3229_p4, %p3228_p2 }
  0x2b   : > { %p3224_p0 = pneg %p3223_p13 }
  0x2d   : > { %p3231_p8 = pnand %p3230_p6, %p3224_p0 }
  0x2f   : > { %3234 = shalt.err (!%p3231_p8)
}
  0x30   : > { %s3534_s30 = smov 512   ;;  %s3535_s21 = smov 32  }
  0x31   : > { %3065 = dma.hbm_to_vmem [thread:$0]  (!%p3656_p5), %s4433_s1, 10240, %s3646_s20, [#allocation8], %s3534_s30, %s3534_s30, %s3535_s21  }
  0x32   : > { %s4435_s3 = sld [smem:[#allocation29_spill]] }
  0x38   : > { %s3235_s10 = scalar_lea.hbm %s4435_s3, 16384 }
  0x39   : > { %p3236_p9 = scmp.ne.s32.totalorder %s4435_s3, %s3235_s10  ;;  %p3242_p12 = scmp.lt.u32.totalorder %s3235_s10, %s4435_s3 }
  0x3b   : > { %p3238_p10 = pnand %p3236_p9, %p3672_p7 }
  0x3d   : > { %p3239_p11 = pneg %p3238_p10 }
  0x3f   : > { %p3244_p13 = pnand %p3242_p12, %p3239_p11 }
  0x41   : > { %3247 = shalt.err (!%p3244_p13)
}
  0x42   : > { %s3248_s20 = scalar_lea.vmem %s3660_s25, 16384  ;;  %p3256_p6 = scmp.lt.s32.totalorder %s3660_s25, %s3660_s25 }
  0x43   : > { %p3249_p0 = scmp.ne.s32.totalorder %s3660_s25, %s3248_s20  ;;  %p3257_p8 = scmp.lt.s32.totalorder %s3248_s20, %s3248_s20 }
  0x45   : > { %p3251_p2 = pnand %p3249_p0, %p3672_p7  ;;  %p3258_p9 = por %p3257_p8, %p3256_p6 }
  0x47   : > { %p3252_p4 = pneg %p3251_p2 }
  0x49   : > { %p3259_p10 = pnand %p3258_p9, %p3252_p4 }
  0x4b   : > { %3262 = shalt.err (!%p3259_p10)
}
  0x4c   : > { %s3536_s9 = smov 256   ;;  %s3537_s10 = smov 16  }
  0x4d   : > { %3071 = dma.hbm_to_vmem [thread:$0]  (!%p3656_p5), %s4435_s3, 16384, %s3660_s25, [#allocation11], %s3536_s9, %s3536_s9, %s3537_s10  }
  0x4e   : > { %s4436_s5 = sld [smem:[#allocation30_spill]] }
  0x54   : > { %s3263_s11 = scalar_lea.hbm %s4436_s5, 4096 }
  0x55   : > { %p3264_p11 = scmp.ne.s32.totalorder %s4436_s5, %s3263_s11  ;;  %p3270_p0 = scmp.lt.u32.totalorder %s3263_s11, %s4436_s5 }
  0x57   : > { %p3266_p12 = pnand %p3264_p11, %p3672_p7 }
  0x59   : > { %p3267_p13 = pneg %p3266_p12 }
  0x5b   : > { %p3272_p2 = pnand %p3270_p0, %p3267_p13 }
  0x5d   : > { %3275 = shalt.err (!%p3272_p2)
}
  0x5e   : > { %s3276_s20 = scalar_lea.vmem %s378_s28, 4096  ;;  %p3284_p9 = scmp.lt.s32.totalorder %s378_s28, %s378_s28 }
  0x5f   : > { %p3277_p4 = scmp.ne.s32.totalorder %s378_s28, %s3276_s20  ;;  %p3285_p10 = scmp.lt.s32.totalorder %s3276_s20, %s3276_s20 }
  0x61   : > { %p3279_p6 = pnand %p3277_p4, %p3672_p7  ;;  %p3286_p3 = por %p3285_p10, %p3284_p9 }
  0x63   : > { %p3280_p8 = pneg %p3279_p6 }
  0x65   : > { %p3287_p1 = pnand %p3286_p3, %p3280_p8 }
  0x67   : > { %3290 = shalt.err (!%p3287_p1)
}
  0x68   : > { %s3538_s25 = smov 128   ;;  %s3539_s9 = smov 8  }
  0x69   : > { %3077 = dma.hbm_to_vmem [thread:$0]  (!%p3656_p5), %s4436_s5, 4096, %s378_s28, [#allocation14], %s3538_s25, %s3538_s25, %s3539_s9  }
  0x6a   : > { %s37_s23 = sadd.s32 1, %s3525_s17  ;;  %s199_s30 = sadd.s32 1, %s3517_s15 }
  0x6b   : > { %p38_p1 = scmp.ge.s32.totalorder %s37_s23, 9  ;;  %p206_p3 = scmp.ne.s32.totalorder %s3517_s15, %s3513_s14 }
  0x6c   : > { %p207_p11 = scmp.eq.s32.totalorder %s3529_s18, 0  ;;  %p212_p13 = scmp.ne.s32.totalorder %s3513_s14, %s3509_s13 }
  0x6d   : > { %s4466_s23 = smov (%p38_p1, %s37_s23), 0  ;;  %p3095_p0 = scmp.lt.s32.totalorder %s3529_s18, 9 }
  0x6e   : > { %4437 = sst [smem:[#allocation26_spill]] %s4466_s23  ;;  %p3744_p12 = por %p207_p11, %p206_p3 }
  0x6f   : > { %s196_s11 = ssub.s32 %s3525_s17, %s4466_s23  ;;  %p4439_p4 = scmp.ne.s32.totalorder %s4429_s22, 0 }
  0x70   : > { %p197_p2 = scmp.eq.s32.totalorder %s196_s11, 0  ;;  %s402_s12 = sand.u32 1, %s3529_s18  }
  0x71   : > { %p3755_p6 = por %p4439_p4, %p212_p13  ;;  %s4414_s19 = sand.u32 1, %s3517_s15  }
  0x72   : > { %s3762_s27 = scalar_select %p197_p2, %s3517_s15, %s199_s30  }
  0x73   : > { %s4440_s28 = scalar_select %p3755_p6, 1, 0 }
  0x74   : > { %4441 = sst [smem:[#allocation27_spill]] %s3762_s27  ;;  %s2464_s29 = sshll.u32 %s4414_s19, 11 }
  0x75   : > { %s2490_s20 = sshll.u32 %s3525_s17, 11  ;;  %s4442_s7 = sld [smem:[#allocation31_spill]] }
  0x76   : > { %s406_s13 = scalar_lea.vmem [#allocation16], %s2464_s29  ;;  %p3776_p8 = pnand %p3095_p0, %p3744_p12 }
  0x77   : > { %s413_s11 = sshll.u32 %s406_s13, 4  ;;  %s3780_s19 = scalar_lea.sflag [#allocation17], %s402_s12  ;;  %s3772_s11 = int_to_ptr.vmem [resolvable:$true] %s413_s11 }
  0x78   : > { %s4443_s30 = scalar_select %p3776_p8, 1, 0 }
  0x79   : > { %p4419_p10 = pneg %p3776_p8 }
  0x7b   : > { %s3770_s16 = scalar_lea.hbm %s4442_s7, %s2490_s20  ;;  %s3296_s21 = scalar_lea.hbm %s4442_s7, 294912 }
  0x7c   : > { %s3291_s9 = scalar_lea.hbm %s3770_s16, 32768  ;;  %p3297_p11 = scmp.lt.u32.totalorder %s3770_s16, %s4442_s7 }
  0x7d   : > { %p3292_p9 = scmp.ne.s32.totalorder %s3770_s16, %s3291_s9  ;;  %p3298_p12 = scmp.lt.u32.totalorder %s3296_s21, %s3291_s9 }
  0x7e   : > { %p3300_p0 = scmp.lt.u32.totalorder %s3291_s9, %s3770_s16 }
  0x7f   : > { %p3294_p1 = pnand %p4419_p10, %p3292_p9  ;;  %p3299_p13 = por %p3298_p12, %p3297_p11 }
  0x81   : > { %p3295_p3 = pneg %p3294_p1  ;;  %p3301_p2 = por %p3300_p0, %p3299_p13 }
  0x83   : > { %p3302_p4 = pnand %p3301_p2, %p3295_p3 }
  0x85   : > { %3305 = shalt.err (!%p3302_p4)
}
  0x86   : > { %s3306_s12 = scalar_lea.vmem %s3772_s11, 32768  ;;  %s3540_s29 = smov [#allocation16]  }
  0x87   : > { %p3307_p9 = scmp.ne.s32.totalorder %s3772_s11, %s3306_s12  ;;  %s3311_s20 = sshll.u32 %s3540_s29, 4  ;;  %s3312_s20 = int_to_ptr.vmem [resolvable:$false] %s3311_s20 }
  0x88   : > { %s3313_s10 = scalar_lea.vmem %s3312_s20, 65536  ;;  %p3314_p5 = scmp.lt.s32.totalorder %s3772_s11, %s3312_s20 }
  0x89   : > { %p3309_p1 = pnand %p3307_p9, %p4419_p10  ;;  %p3315_p11 = scmp.lt.s32.totalorder %s3313_s10, %s3306_s12 }
  0x8b   : > { %p3310_p6 = pneg %p3309_p1  ;;  %p3316_p12 = por %p3315_p11, %p3314_p5 }
  0x8d   : > { %p3317_p13 = pnand %p3316_p12, %p3310_p6 }
  0x8f   : > { %3320 = shalt.err (!%p3317_p13)
}
  0x90   : > { %s3541_s9 = smov 18432   ;;  %s3542_s21 = smov 2048  }
  0x91   : > { %3084 = dma.hbm_to_vmem [thread:$0]  (!%p3776_p8), %s3770_s16, 32768, %s3772_s11, %s3780_s19, %s3541_s9, %s3542_s21, %s3538_s25  }
  0x92   : > { %s3543_s13 = smov [#allocation5]   ;;  %s3544_s29 = smov [#allocation9]  }
  0x93   : > { %s319_s1 = sshll.u32 %s3543_s13, 4  ;;  %s343_s3 = sshll.u32 %s3544_s29, 4  ;;  %s320_s1 = int_to_ptr.vmem [resolvable:$true] %s319_s1  ;;  %s344_s3 = int_to_ptr.vmem [resolvable:$true] %s343_s3 }
  0x94   : > { %s3321_s10 = scalar_lea.hbm %s4397_s0, 256 }
  0x95   : > { %p3322_p5 = scmp.ne.s32.totalorder %s4397_s0, %s3321_s10  ;;  %p3328_p0 = scmp.lt.u32.totalorder %s3321_s10, %s4397_s0 }
  0x97   : > { %p3324_p6 = pnand %p3322_p5, %p3672_p7 }
  0x99   : > { %p3325_p3 = pneg %p3324_p6 }
  0x9b   : > { %p3330_p2 = pnand %p3328_p0, %p3325_p3 }
  0x9d   : > { %3333 = shalt.err (!%p3330_p2)
}
  0x9e   : > { %s3334_s25 = scalar_lea.vmem %s320_s1, 256  ;;  %p3342_p11 = scmp.lt.s32.totalorder %s320_s1, %s320_s1 }
  0x9f   : > { %p3335_p4 = scmp.ne.s32.totalorder %s320_s1, %s3334_s25  ;;  %p3343_p12 = scmp.lt.s32.totalorder %s3334_s25, %s3334_s25 }
  0xa1   : > { %p3337_p9 = pnand %p3335_p4, %p3672_p7  ;;  %p3344_p13 = por %p3343_p12, %p3342_p11 }
  0xa3   : > { %p3338_p1 = pneg %p3337_p9 }
  0xa5   : > { %p3345_p10 = pnand %p3344_p13, %p3338_p1 }
  0xa7   : > { %3348 = shalt.err (!%p3345_p10)
}
  0xa8   : > { %p4444_p5 = scmp.ne.s32.totalorder %s4432_s26, 0  ;;  %s3349_s16 = scalar_lea.hbm %s4399_s2, 64 }
  0xa9   : > { %p3350_p6 = scmp.ne.s32.totalorder %s4399_s2, %s3349_s16  ;;  %p3356_p10 = scmp.lt.u32.totalorder %s3349_s16, %s4399_s2 }
  0xaa   : > { %3062 = dma.hbm_to_vmem [thread:$0]  (!%p4444_p5), %s4397_s0, 256, %s320_s1, [#allocation6]  }
  0xab   : > { %p3352_p3 = pnand %p3350_p6, %p3672_p7 }
  0xad   : > { %p3353_p0 = pneg %p3352_p3 }
  0xaf   : > { %p3358_p2 = pnand %p3356_p10, %p3353_p0 }
  0xb1   : > { %3361 = shalt.err (!%p3358_p2)
}
  0xb2   : > { %s3362_s29 = scalar_lea.vmem %s344_s3, 64  ;;  %p3370_p11 = scmp.lt.s32.totalorder %s344_s3, %s344_s3 }
  0xb3   : > { %p3363_p4 = scmp.ne.s32.totalorder %s344_s3, %s3362_s29  ;;  %p3371_p12 = scmp.lt.s32.totalorder %s3362_s29, %s3362_s29 }
  0xb5   : > { %p3365_p9 = pnand %p3363_p4, %p3672_p7  ;;  %p3372_p13 = por %p3371_p12, %p3370_p11 }
  0xb7   : > { %p3366_p1 = pneg %p3365_p9 }
  0xb9   : > { %p3373_p8 = pnand %p3372_p13, %p3366_p1 }
  0xbb   : > { %3376 = shalt.err (!%p3373_p8)
}
  0xbc   : > { %3068 = dma.hbm_to_vmem [thread:$0]  (!%p4444_p5), %s4399_s2, 64, %s344_s3, [#allocation8]  }
  0xbd   : > { %s3545_s12 = smov [#allocation12]   ;;  %s3546_s25 = smov [#allocation15]  }
  0xbe   : > { %s367_s10 = sshll.u32 %s3545_s12, 4  ;;  %s391_s5 = sshll.u32 %s3546_s25, 4  ;;  %s368_s10 = int_to_ptr.vmem [resolvable:$true] %s367_s10  ;;  %s392_s5 = int_to_ptr.vmem [resolvable:$true] %s391_s5 }
  0xbf   : > { %s3377_s27 = scalar_lea.hbm %s4401_s4, 32 }
  0xc0   : > { %p3378_p8 = scmp.ne.s32.totalorder %s4401_s4, %s3377_s27  ;;  %p3384_p0 = scmp.lt.u32.totalorder %s3377_s27, %s4401_s4 }
  0xc2   : > { %p3380_p6 = pnand %p3378_p8, %p3672_p7 }
  0xc4   : > { %p3381_p3 = pneg %p3380_p6 }
  0xc6   : > { %p3386_p10 = pnand %p3384_p0, %p3381_p3 }
  0xc8   : > { %3389 = shalt.err (!%p3386_p10)
}
  0xc9   : > { %s3390_s3 = scalar_lea.vmem %s368_s10, 32  ;;  %p3398_p1 = scmp.lt.s32.totalorder %s368_s10, %s368_s10 }
  0xca   : > { %p3391_p2 = scmp.ne.s32.totalorder %s368_s10, %s3390_s3  ;;  %p3399_p11 = scmp.lt.s32.totalorder %s3390_s3, %s3390_s3 }
  0xcc   : > { %p3393_p4 = pnand %p3391_p2, %p3672_p7  ;;  %p3400_p12 = por %p3399_p11, %p3398_p1 }
  0xce   : > { %p3394_p9 = pneg %p3393_p4 }
  0xd0   : > { %p3401_p13 = pnand %p3400_p12, %p3394_p9 }
  0xd2   : > { %3404 = shalt.err (!%p3401_p13)
}
  0xd3   : > { %3074 = dma.hbm_to_vmem [thread:$0]  (!%p4444_p5), %s4401_s4, 32, %s368_s10, [#allocation11]  }
  0xd4   : > { %s4445_s1 = sand.u32 1, %s3517_s15   ;;  %s3405_s7 = scalar_lea.hbm %s4403_s6, 16 }
  0xd5   : > { %s2467_s20 = sshll.u32 %s4445_s1, 4  ;;  %p3406_p8 = scmp.ne.s32.totalorder %s4403_s6, %s3405_s7 }
  0xd6   : > { %p3412_p0 = scmp.lt.u32.totalorder %s3405_s7, %s4403_s6 }
  0xd7   : > { %p3408_p6 = pnand %p3406_p8, %p3672_p7 }
  0xd9   : > { %p3409_p3 = pneg %p3408_p6 }
  0xdb   : > { %p3414_p10 = pnand %p3412_p0, %p3409_p3 }
  0xdd   : > { %3417 = shalt.err (!%p3414_p10)
}
  0xde   : > { %s3418_s10 = scalar_lea.vmem %s392_s5, 16  ;;  %s3425_s9 = scalar_lea.vmem %s392_s5, 32 }
  0xdf   : > { %p3419_p2 = scmp.ne.s32.totalorder %s392_s5, %s3418_s10  ;;  %p3426_p1 = scmp.lt.s32.totalorder %s392_s5, %s392_s5 }
  0xe0   : > { %p3427_p11 = scmp.lt.s32.totalorder %s3425_s9, %s3418_s10 }
  0xe1   : > { %p3421_p4 = pnand %p3419_p2, %p3672_p7 }
  0xe2   : > { %p3428_p12 = por %p3427_p11, %p3426_p1 }
  0xe3   : > { %p3422_p9 = pneg %p3421_p4 }
  0xe5   : > { %p3429_p13 = pnand %p3428_p12, %p3422_p9 }
  0xe7   : > { %3432 = shalt.err (!%p3429_p13)
}
  0xe8   : > { %3080 = dma.hbm_to_vmem [thread:$0]  (!%p4444_p5), %s4403_s6, 16, %s392_s5, [#allocation14]  }
  0xe9   : > { %s2491_s13 = sshll.u32 %s3525_s17, 8  ;;  %s427_s12 = scalar_lea.vmem [#allocation18], %s2467_s20 }
  0xea   : > { %s3887_s24 = scalar_lea.hbm %s4405_s8, %s2491_s13  ;;  %s435_s25 = sshll.u32 %s427_s12, 4  ;;  %s436_s25 = int_to_ptr.vmem [resolvable:$true] %s435_s25 }
  0xeb   : > { %s3433_s26 = scalar_lea.hbm %s3887_s24, 256  ;;  %p4446_p8 = scmp.ne.s32.totalorder %s4443_s30, 0 }
  0xec   : > { %p3434_p7 = scmp.ne.s32.totalorder %s3887_s24, %s3433_s26  ;;  %s3438_s23 = scalar_lea.hbm %s4405_s8, 2304 }
  0xed   : > { %p4447_p6 = pneg %p4446_p8  ;;  %p3439_p5 = scmp.lt.u32.totalorder %s3887_s24, %s4405_s8 }
  0xee   : > { %p3440_p10 = scmp.lt.u32.totalorder %s3438_s23, %s3433_s26  ;;  %p3442_p4 = scmp.lt.u32.totalorder %s3433_s26, %s3887_s24 }
  0xef   : > { %p3436_p3 = pnand %p3434_p7, %p4447_p6 }
  0xf0   : > { %p3441_p2 = por %p3440_p10, %p3439_p5 }
  0xf1   : > { %p3437_p0 = pneg %p3436_p3 }
  0xf2   : > { %p3443_p9 = por %p3442_p4, %p3441_p2 }
  0xf4   : > { %p3444_p1 = pnand %p3443_p9, %p3437_p0 }
  0xf6   : > { %3447 = shalt.err (!%p3444_p1)
}
  0xf7   : > { %s3448_s20 = scalar_lea.vmem %s436_s25, 256  ;;  %p4448_p12 = pmov %p4447_p6 }
  0xf8   : > { %p3449_p11 = scmp.ne.s32.totalorder %s436_s25, %s3448_s20  ;;  %s3547_s11 = smov [#allocation18]  }
  0xf9   : > { %s3453_s10 = sshll.u32 %s3547_s11, 4  ;;  %s3454_s10 = int_to_ptr.vmem [resolvable:$false] %s3453_s10 }
  0xfa   : > { %p3451_p13 = pnand %p3449_p11, %p4448_p12  ;;  %s3455_s9 = scalar_lea.vmem %s3454_s10, 512 }
  0xfb   : > { %p3456_p6 = scmp.lt.s32.totalorder %s436_s25, %s3454_s10  ;;  %p3457_p3 = scmp.lt.s32.totalorder %s3455_s9, %s3448_s20 }
  0xfc   : > { %p3452_p7 = pneg %p3451_p13 }
  0xfd   : > { %p3458_p5 = por %p3457_p3, %p3456_p6 }
  0xff   : > { %p3459_p10 = pnand %p3458_p5, %p3452_p7 }
 0x101   : > { %3462 = shalt.err (!%p3459_p10)
}
 0x102   : > { %3087 = dma.hbm_to_vmem [thread:$0]  (!%p4446_p8), %s3887_s24, 256, %s436_s25, %s3780_s19  }
 0x103   : > { %s4449_s21 = sld [smem:[#allocation25_spill]] }
 0x109   : > { %p4450_p0 = scmp.ne.s32.totalorder %s4449_s21, 0 }
 0x10a   : > { %p4451_p2 = scmp.ne.s32.totalorder (!%p4450_p0), %s4429_s22, 0 }
 0x10b   : > { %444 = sbr.rel (%p4450_p0) target bundleno = 1898 (0x76a), region = 56 }
 0x112   : > { %3488 = dma.done.wait (%p4451_p2), [#allocation6], 256  }
 0x113   : > { %3490 = vsyncadd (%p4451_p2), [#allocation6], 4294967040 }
 0x114   : > { %3492 = dma.done.wait (%p4451_p2), [#allocation8], 10304  }
 0x115   : > { %3494 = vsyncadd (%p4451_p2), [#allocation8], 4294956992 }
 0x116   : > { %3496 = dma.done.wait (%p4451_p2), [#allocation11], 16416  }
 0x117   : > { %3498 = vsyncadd (%p4451_p2), [#allocation11], 4294950880 }
 0x118   : > { %3500 = dma.done.wait (%p4451_p2), [#allocation14], 4112  }
 0x119   : > { %3502 = vsyncadd (%p4451_p2), [#allocation14], 4294963184  ;;  %s4452_s19 = sadd.s32 4294967295, %s3529_s18   ;;  %s476_s3 = sand.u32 1, %s3513_s14  }
 0x11a   : > { %s474_s30 = sand.u32 1, %s4452_s19   ;;  %s2478_s13 = sshll.u32 %s476_s3, 11 }
 0x11b   : > { %s475_s29 = scalar_lea.sflag [#allocation17], %s474_s30  ;;  %s3930_s1 = scalar_lea.vmem [#allocation16], %s2478_s13 }
 0x11c   : > { %p4453_p8 = scmp.ne.s32.totalorder %s4440_s28, 0 }
 0x11e   : > { %3504 = dma.done.wait (%p4453_p8), %s475_s29, 33024  }
 0x11f   : > { %3506 = vsyncadd (%p4453_p8), %s475_s29, 4294934272  ;;  %s4454_s24 = sld [smem:[#allocation24_spill]]  ;;  %s3936_s12 = sshll.u32 %s476_s3, 4 }
 0x120   : > { %s4455_s7 = sld [smem:[#allocation32_spill]]  ;;  %s487_s27 = scalar_lea.vmem [#allocation18], %s3936_s12 }
 0x125   : > { %s2480_s22 = sshll.u32 %s4454_s24, 4  ;;  %p2482_p9 = scmp.ne.s32.totalorder %s4454_s24, 0 }
 0x126   : > { %p542_p4 = scmp.lt.s32.totalorder %s2480_s22, 143  ;;  %v560_v0 = vld [vmem:[#allocation7 + $0x8] sm:$0xff] (!%p2482_p9)  ;;  %v559_v2 = vld [vmem:[#allocation7] sm:$0xff] (!%p2482_p9)  ;;  %vm661_vm0 = vcmask (!%p2482_p9), 261120   ;;  %v3946_v29 = vld [vmem:[#allocation5 + $0x8] sm:$0xff] (!%p2482_p9)  ;;  %vm1206_vm1 = vcmask (!%p2482_p9), 7168  }
 0x127   : > { %556 = sbr.rel (%p2482_p9) target bundleno = 1058 (0x422), region = 96  ;;  %v564_v1 = vld [vmem:[#allocation7 + $0x28] sm:$0xff] (!%p2482_p9)  ;;  %v563_v4 = vld [vmem:[#allocation7 + $0x20] sm:$0xff] (!%p2482_p9)  ;;  %2483 = vmatprep.mubr.msk.f32.mxu1 (!%p2482_p9), %vm661_vm0, %v3946_v29  ;;  %v813_v58 = vld [vmem:[#allocation10 + $0x10] sm:$0xff] (!%p2482_p9) }
 0x128   : > { %s4468_s22 = smov (!%p542_p4, %s2480_s22), 143  ;;  %v2527_v3 = vpack.c.bf16 (!%p2482_p9), %v564_v1, %v560_v0  ;;  %v568_v5 = vld [vmem:[#allocation7 + $0x48] sm:$0xff] (!%p2482_p9)  ;;  %v2529_v7 = vpack.c.bf16 (!%p2482_p9), %v563_v4, %v559_v2  ;;  %v567_v9 = vld [vmem:[#allocation7 + $0x40] sm:$0xff] (!%p2482_p9)  ;;  %v817_v0 = vld [vmem:[#allocation10 + $0x30] sm:$0xff] (!%p2482_p9) }
 0x129   : > { %s2481_s25 = sshll.u32 %s4468_s22, 3  ;;  %v572_v6 = vld [vmem:[#allocation7 + $0x68] sm:$0xff] (!%p2482_p9)  ;;  %v571_v10 = vld [vmem:[#allocation7 + $0x60] sm:$0xff] (!%p2482_p9) }
 0x12a   : > { %s3942_s23 = scalar_lea.vmem %s4455_s7, %s2481_s25  ;;  %v2531_v8 = vpack.c.bf16 (!%p2482_p9), %v572_v6, %v568_v5  ;;  %v576_v11 = vld [vmem:[#allocation7 + $0x88] sm:$0xff] (!%p2482_p9)  ;;  %2528 = vmatprep.subr.bf16.mxu1 (!%p2482_p9), %v2527_v3  ;;  %v2533_v13 = vpack.c.bf16 (!%p2482_p9), %v571_v10, %v567_v9  ;;  %v575_v15 = vld [vmem:[#allocation7 + $0x80] sm:$0xff] (!%p2482_p9)  ;;  %v821_v10 = vld [vmem:[#allocation10 + $0x50] sm:$0xff] (!%p2482_p9) }
 0x12b   : > { %v580_v12 = vld [vmem:[#allocation7 + $0xa8] sm:$0xff] (!%p2482_p9)  ;;  %2530 = vmatpush1.bf16.msra.mxu1 (!%p2482_p9), %v2529_v7  ;;  %v579_v16 = vld [vmem:[#allocation7 + $0xa0] sm:$0xff] (!%p2482_p9) }
 0x12c   : > { %2532 = vmatprep.subr.bf16.mxu1 (!%p2482_p9), %v2531_v8  ;;  %v2535_v14 = vpack.c.bf16 (!%p2482_p9), %v580_v12, %v576_v11  ;;  %v584_v17 = vld [vmem:[#allocation7 + $0xc8] sm:$0xff] (!%p2482_p9)  ;;  %v2537_v19 = vpack.c.bf16 (!%p2482_p9), %v579_v16, %v575_v15  ;;  %v583_v21 = vld [vmem:[#allocation7 + $0xc0] sm:$0xff] (!%p2482_p9)  ;;  %v562_v15 = vld [vmem:[#allocation7 + $0x18] sm:$0xff] (!%p2482_p9) }
 0x12d   : > { %v588_v18 = vld [vmem:[#allocation7 + $0xe8] sm:$0xff] (!%p2482_p9)  ;;  %v587_v22 = vld [vmem:[#allocation7 + $0xe0] sm:$0xff] (!%p2482_p9)  ;;  %v566_v16 = vld [vmem:[#allocation7 + $0x38] sm:$0xff] (!%p2482_p9) }
 0x12e   : > { %v2539_v20 = vpack.c.bf16 %v588_v18, %v584_v17  ;;  %v592_v23 = vld [vmem:[#allocation7 + $0x108] sm:$0xff]  ;;  %v2541_v25 = vpack.c.bf16 %v587_v22, %v583_v21  ;;  %v591_v27 = vld [vmem:[#allocation7 + $0x100] sm:$0xff]  ;;  %v825_v21 = vld [vmem:[#allocation10 + $0x70] sm:$0xff]  ;;  %v2567_v22 = vpack.c.bf16 %v566_v16, %v562_v15 }
 0x12f   : > { %2534 = vmatpush1.bf16.msra.mxu1 %v2533_v13  ;;  %v596_v24 = vld [vmem:[#allocation7 + $0x128] sm:$0xff]  ;;  %v595_v28 = vld [vmem:[#allocation7 + $0x120] sm:$0xff]  ;;  %v601_v16 = vld [vmem:[#allocation7 + $0x150] sm:$0xff] }
 0x130   : > { %2536 = vmatprep.subr.bf16.mxu1 %v2535_v14  ;;  %v2543_v26 = vpack.c.bf16 %v596_v24, %v592_v23  ;;  %v600_v30 = vld [vmem:[#allocation7 + $0x148] sm:$0xff]  ;;  %v2545_v32 = vpack.c.bf16 %v595_v28, %v591_v27  ;;  %v599_v34 = vld [vmem:[#allocation7 + $0x140] sm:$0xff]  ;;  %v561_v23 = vld [vmem:[#allocation7 + $0x10] sm:$0xff] }
 0x131   : > { %v604_v31 = vld [vmem:[#allocation7 + $0x168] sm:$0xff]  ;;  %v603_v35 = vld [vmem:[#allocation7 + $0x160] sm:$0xff]  ;;  %v565_v24 = vld [vmem:[#allocation7 + $0x30] sm:$0xff] }
 0x132   : > { %v2547_v33 = vpack.c.bf16 %v604_v31, %v600_v30  ;;  %v608_v36 = vld [vmem:[#allocation7 + $0x188] sm:$0xff]  ;;  %v2549_v38 = vpack.c.bf16 %v603_v35, %v599_v34  ;;  %v607_v40 = vld [vmem:[#allocation7 + $0x180] sm:$0xff]  ;;  %v3950_v30 = vld [vmem:[#allocation5] sm:$0xff] }
 0x133   : > { %2538 = vmatpush1.bf16.msra.mxu1 %v2537_v19  ;;  %v612_v37 = vld [vmem:[#allocation7 + $0x1a8] sm:$0xff]  ;;  %v611_v41 = vld [vmem:[#allocation7 + $0x1a0] sm:$0xff]  ;;  %v829_v35 = vld [vmem:[#allocation10 + $0x90] sm:$0xff] }
 0x134   : > { %2540 = vmatprep.subr.bf16.mxu1 %v2539_v20  ;;  %v2551_v39 = vpack.c.bf16 %v612_v37, %v608_v36  ;;  %v616_v42 = vld [vmem:[#allocation7 + $0x1c8] sm:$0xff]  ;;  %v2553_v44 = vpack.c.bf16 %v611_v41, %v607_v40  ;;  %v615_v46 = vld [vmem:[#allocation7 + $0x1c0] sm:$0xff]  ;;  %v573_v37 = vld [vmem:[#allocation7 + $0x70] sm:$0xff] }
 0x135   : > { %v620_v43 = vld [vmem:[#allocation7 + $0x1e8] sm:$0xff]  ;;  %v619_v47 = vld [vmem:[#allocation7 + $0x1e0] sm:$0xff]  ;;  %v578_v41 = vld [vmem:[#allocation7 + $0x98] sm:$0xff] }
 0x136   : > { %v2555_v45 = vpack.c.bf16 %v620_v43, %v616_v42  ;;  %v624_v48 = vld [vmem:[#allocation7 + $0x208] sm:$0xff]  ;;  %v623_v50 = vld [vmem:[#allocation7 + $0x200] sm:$0xff]  ;;  %v2557_v54 = vpack.c.bf16 %v619_v47, %v615_v46  ;;  %v582_v42 = vld [vmem:[#allocation7 + $0xb8] sm:$0xff] }
 0x137   : > { %2542 = vmatpush1.bf16.msra.mxu1 %v2541_v25  ;;  %v628_v49 = vld [vmem:[#allocation7 + $0x228] sm:$0xff]  ;;  %v627_v51 = vld [vmem:[#allocation7 + $0x220] sm:$0xff]  ;;  %v570_v25 = vld [vmem:[#allocation7 + $0x58] sm:$0xff] }
 0x138   : > { %2544 = vmatprep.subr.bf16.mxu1 %v2543_v26  ;;  %v812_v52 = vld [vmem:[#allocation10 + $0x8] sm:$0xff]  ;;  %v814_v53 = vld [vmem:[#allocation10 + $0x18] sm:$0xff]  ;;  %v811_v57 = vld [vmem:[#allocation10] sm:$0xff]  ;;  %v2559_v60 = vpack.c.bf16 %v628_v49, %v624_v48  ;;  %v2561_v6 = vpack.c.bf16 %v627_v51, %v623_v50  ;;  %v2575_v49 = vpack.c.bf16 %v582_v42, %v578_v41 }
 0x139   : > { %v632_v55 = vld [vmem:[#allocation7 + $0x248] sm:$0xff]  ;;  %v2607_v56 = vpack.c.bf16 %v814_v53, %v812_v52  ;;  %v2609_v61 = vpack.c.bf16 %v813_v58, %v811_v57  ;;  %v818_v62 = vld [vmem:[#allocation10 + $0x38] sm:$0xff]  ;;  %v833_v48 = vld [vmem:[#allocation10 + $0xb0] sm:$0xff] }
 0x13a   : > { %v816_v59 = vld [vmem:[#allocation10 + $0x28] sm:$0xff]  ;;  %v815_v63 = vld [vmem:[#allocation10 + $0x20] sm:$0xff]  ;;  %v822_v4 = vld [vmem:[#allocation10 + $0x58] sm:$0xff] }
 0x13b   : > { %2546 = vmatpush1.bf16.msra.mxu1 %v2545_v32  ;;  %v636_v1 = vld [vmem:[#allocation7 + $0x268] sm:$0xff]  ;;  %2608 = vmatprep.subr.bf16.mxu0 %v2607_v56  ;;  %v2611_v2 = vpack.c.bf16 %v818_v62, %v816_v59  ;;  %v2613_v5 = vpack.c.bf16 %v817_v0, %v815_v63  ;;  %v631_v7 = vld [vmem:[#allocation7 + $0x240] sm:$0xff]  ;;  %v574_v26 = vld [vmem:[#allocation7 + $0x78] sm:$0xff]  ;;  %v2569_v32 = vpack.c.bf16 %v565_v24, %v561_v23 }
 0x13c   : > { %2548 = vmatprep.subr.bf16.mxu1 %v2547_v33  ;;  %v820_v3 = vld [vmem:[#allocation10 + $0x48] sm:$0xff]  ;;  %2610 = vmatpush1.bf16.msra.mxu0 %v2609_v61  ;;  %v819_v9 = vld [vmem:[#allocation10 + $0x40] sm:$0xff]  ;;  %v2563_v11 = vpack.c.bf16 %v636_v1, %v632_v55  ;;  %v826_v14 = vld [vmem:[#allocation10 + $0x78] sm:$0xff]  ;;  %v2571_v36 = vpack.c.bf16 %v574_v26, %v570_v25 }
 0x13d   : > { %2612 = vmatprep.subr.bf16.mxu0 %v2611_v2  ;;  %v2615_v8 = vpack.c.bf16 %v822_v4, %v820_v3  ;;  %v635_v12 = vld [vmem:[#allocation7 + $0x260] sm:$0xff]  ;;  %v824_v13 = vld [vmem:[#allocation10 + $0x68] sm:$0xff]  ;;  %v2617_v17 = vpack.c.bf16 %v821_v10, %v819_v9  ;;  %v586_v53 = vld [vmem:[#allocation7 + $0xd8] sm:$0xff] }
 0x13e   : > { %v2565_v18 = vpack.c.bf16 %v635_v12, %v631_v7  ;;  %v2619_v19 = vpack.c.bf16 %v826_v14, %v824_v13  ;;  %v823_v20 = vld [vmem:[#allocation10 + $0x60] sm:$0xff]  ;;  %v828_v27 = vld [vmem:[#allocation10 + $0x88] sm:$0xff]  ;;  %v830_v28 = vld [vmem:[#allocation10 + $0x98] sm:$0xff] }
 0x13f   : > { %2550 = vmatpush1.bf16.msra.mxu1 %v2549_v38  ;;  %v2621_v31 = vpack.c.bf16 %v825_v21, %v823_v20  ;;  %v569_v33 = vld [vmem:[#allocation7 + $0x50] sm:$0xff]  ;;  %v827_v34 = vld [vmem:[#allocation10 + $0x80] sm:$0xff]  ;;  %v2623_v38 = vpack.c.bf16 %v830_v28, %v828_v27  ;;  %v834_v40 = vld [vmem:[#allocation10 + $0xb8] sm:$0xff] }
 0x140   : > { %2552 = vmatprep.subr.bf16.mxu1 %v2551_v39  ;;  %2614 = vmatpush1.bf16.msra.mxu0 %v2613_v5  ;;  %v832_v39 = vld [vmem:[#allocation10 + $0xa8] sm:$0xff]  ;;  %v2625_v43 = vpack.c.bf16 %v829_v35, %v827_v34  ;;  %v831_v47 = vld [vmem:[#allocation10 + $0xa0] sm:$0xff]  ;;  %v838_v52 = vld [vmem:[#allocation10 + $0xd8] sm:$0xff] }
 0x141   : > { %2616 = vmatprep.subr.bf16.mxu0 %v2615_v8  ;;  %v2627_v46 = vpack.c.bf16 %v834_v40, %v832_v39  ;;  %v581_v50 = vld [vmem:[#allocation7 + $0xb0] sm:$0xff]  ;;  %v2629_v55 = vpack.c.bf16 %v833_v48, %v831_v47  ;;  %v835_v59 = vld [vmem:[#allocation10 + $0xc0] sm:$0xff]  ;;  %v842_v63 = vld [vmem:[#allocation10 + $0xf8] sm:$0xff] }
 0x142   : > { %v836_v51 = vld [vmem:[#allocation10 + $0xc8] sm:$0xff]  ;;  %v594_v0 = vld [vmem:[#allocation7 + $0x118] sm:$0xff] }
 0x143   : > { %2554 = vmatpush1.bf16.msra.mxu1 %v2553_v44  ;;  %v2573_v44 = vpack.c.bf16 %v573_v37, %v569_v33  ;;  %v585_v57 = vld [vmem:[#allocation7 + $0xd0] sm:$0xff]  ;;  %v2631_v58 = vpack.c.bf16 %v838_v52, %v836_v51  ;;  %v598_v1 = vld [vmem:[#allocation7 + $0x138] sm:$0xff] }
 0x144   : > { %2556 = vmatprep.subr.bf16.mxu1 %v2555_v45  ;;  %2618 = vmatpush1.bf16.msra.mxu0 %v2617_v17  ;;  %v577_v45 = vld [vmem:[#allocation7 + $0x90] sm:$0xff]  ;;  %v2583_v8 = vpack.c.bf16 %v598_v1, %v594_v0  ;;  %v602_v12 = vld [vmem:[#allocation7 + $0x158] sm:$0xff] }
 0x145   : > { %2620 = vmatprep.subr.bf16.mxu0 %v2619_v19  ;;  %v2577_v56 = vpack.c.bf16 %v581_v50, %v577_v45  ;;  %v589_v61 = vld [vmem:[#allocation7 + $0xf0] sm:$0xff]  ;;  %v606_v13 = vld [vmem:[#allocation7 + $0x178] sm:$0xff] }
 0x146   : > { %v840_v62 = vld [vmem:[#allocation10 + $0xe8] sm:$0xff]  ;;  %v2581_v3 = vpack.c.bf16 %v589_v61, %v585_v57  ;;  %v841_v7 = vld [vmem:[#allocation10 + $0xf0] sm:$0xff]  ;;  %v2587_v20 = vpack.c.bf16 %v606_v13, %v602_v12  ;;  %v850_v23 = vld [vmem:[#allocation10 + $0x138] sm:$0xff] }
 0x147   : > { %2558 = vmatpush1.bf16.msra.mxu1 %v2557_v54  ;;  %v590_v54 = vld [vmem:[#allocation7 + $0xf8] sm:$0xff]  ;;  %v593_v4 = vld [vmem:[#allocation7 + $0x110] sm:$0xff]  ;;  %v2635_v5 = vpack.c.bf16 %v842_v63, %v840_v62  ;;  %v863_v12 = vld [vmem:[#allocation10 + $0x1a0] sm:$0xff] }
 0x148   : > { %2560 = vmatprep.subr.bf16.mxu1 %v2559_v60  ;;  %2622 = vmatpush1.bf16.msra.mxu0 %v2621_v31  ;;  %v2579_v60 = vpack.c.bf16 %v590_v54, %v586_v53  ;;  %v597_v9 = vld [vmem:[#allocation7 + $0x130] sm:$0xff]  ;;  %v610_v24 = vld [vmem:[#allocation7 + $0x198] sm:$0xff] }
 0x149   : > { %2624 = vmatprep.subr.bf16.mxu0 %v2623_v38  ;;  %v844_v10 = vld [vmem:[#allocation10 + $0x108] sm:$0xff]  ;;  %v2585_v15 = vpack.c.bf16 %v597_v9, %v593_v4  ;;  %v845_v19 = vld [vmem:[#allocation10 + $0x110] sm:$0xff]  ;;  %v854_v37 = vld [vmem:[#allocation10 + $0x158] sm:$0xff] }
 0x14a   : > { %v605_v21 = vld [vmem:[#allocation7 + $0x170] sm:$0xff]  ;;  %v614_v25 = vld [vmem:[#allocation7 + $0x1b8] sm:$0xff] }
 0x14b   : > { %2562 = vmatpush1.bf16.msra.mxu1 %v2561_v6  ;;  %v839_v6 = vld [vmem:[#allocation10 + $0xe0] sm:$0xff]  ;;  %v2589_v27 = vpack.c.bf16 %v605_v21, %v601_v16  ;;  %v609_v28 = vld [vmem:[#allocation7 + $0x190] sm:$0xff]  ;;  %v2591_v34 = vpack.c.bf16 %v614_v25, %v610_v24  ;;  %v618_v38 = vld [vmem:[#allocation7 + $0x1d8] sm:$0xff] }
 0x14c   : > { %2564 = vmatprep.subr.bf16.mxu1 %v2563_v11  ;;  %2626 = vmatpush1.bf16.msra.mxu0 %v2625_v43  ;;  %v846_v11 = vld [vmem:[#allocation10 + $0x118] sm:$0xff]  ;;  %v2637_v14 = vpack.c.bf16 %v841_v7, %v839_v6  ;;  %v849_v33 = vld [vmem:[#allocation10 + $0x130] sm:$0xff]  ;;  %v856_v48 = vld [vmem:[#allocation10 + $0x168] sm:$0xff] }
 0x14d   : > { %2628 = vmatprep.subr.bf16.mxu0 %v2627_v46  ;;  %v2639_v17 = vpack.c.bf16 %v846_v11, %v844_v10  ;;  %v613_v35 = vld [vmem:[#allocation7 + $0x1b0] sm:$0xff]  ;;  %v622_v39 = vld [vmem:[#allocation7 + $0x1f8] sm:$0xff]  ;;  %v871_v24 = vld [vmem:[#allocation10 + $0x1e0] sm:$0xff] }
 0x14e   : > { %v2593_v41 = vpack.c.bf16 %v613_v35, %v609_v28  ;;  %v617_v42 = vld [vmem:[#allocation7 + $0x1d0] sm:$0xff]  ;;  %v2595_v46 = vpack.c.bf16 %v622_v39, %v618_v38  ;;  %v626_v50 = vld [vmem:[#allocation7 + $0x218] sm:$0xff] }
 0x14f   : > { %2566 = vmatpush1.bf16.msra.mxu1 %v2565_v18  ;;  %v843_v18 = vld [vmem:[#allocation10 + $0x100] sm:$0xff]  ;;  %v853_v45 = vld [vmem:[#allocation10 + $0x150] sm:$0xff]  ;;  %v864_v7 = vld [vmem:[#allocation10 + $0x1a8] sm:$0xff] }
 0x150   : > { %2568 = vmatprep.subr.bf16.mxu1 %v2567_v22  ;;  %2630 = vmatpush1.bf16.msra.mxu0 %v2629_v55  ;;  %v848_v22 = vld [vmem:[#allocation10 + $0x128] sm:$0xff]  ;;  %v2641_v26 = vpack.c.bf16 %v845_v19, %v843_v18  ;;  %v630_v51 = vld [vmem:[#allocation7 + $0x238] sm:$0xff]  ;;  %v867_v18 = vld [vmem:[#allocation10 + $0x1c0] sm:$0xff] }
 0x151   : > { %2632 = vmatprep.subr.bf16.mxu0 %v2631_v58  ;;  %v2643_v31 = vpack.c.bf16 %v850_v23, %v848_v22  ;;  %v621_v47 = vld [vmem:[#allocation7 + $0x1f0] sm:$0xff]  ;;  %v2599_v58 = vpack.c.bf16 %v630_v51, %v626_v50  ;;  %v634_v61 = vld [vmem:[#allocation7 + $0x258] sm:$0xff] }
 0x152   : > { %730 = vmatmul.mubr.f32.vlgmr.msra.gmra.mrb[0].mxu1 %v3950_v30  ;;  %v2597_v53 = vpack.c.bf16 %v621_v47, %v617_v42  ;;  %v625_v54 = vld [vmem:[#allocation7 + $0x210] sm:$0xff]  ;;  %v638_v62 = vld [vmem:[#allocation7 + $0x278] sm:$0xff]  ;;  %v1115_v42 = vld [vmem:[#allocation13 + $0xa0] sm:$0xff] }
 0x153   : > { %2570 = vmatpush1.bf16.msra.mxu1 %v2569_v32  ;;  %2484 = vmatprep.mubr.msk.f32.mxu1 %vm661_vm0, %v3946_v29  ;;  %v837_v29 = vld [vmem:[#allocation10 + $0xd0] sm:$0xff]  ;;  %v847_v32 = vld [vmem:[#allocation10 + $0x120] sm:$0xff]  ;;  %v872_v21 = vld [vmem:[#allocation10 + $0x1e8] sm:$0xff] }
 0x154   : > { %2572 = vmatprep.subr.bf16.mxu1 %v2571_v36  ;;  %v2633_v2 = vpack.c.bf16 %v837_v29, %v835_v59  ;;  %v852_v36 = vld [vmem:[#allocation10 + $0x148] sm:$0xff]  ;;  %v2645_v40 = vpack.c.bf16 %v849_v33, %v847_v32  ;;  %v857_v57 = vld [vmem:[#allocation10 + $0x170] sm:$0xff]  ;;  %v874_v22 = vld [vmem:[#allocation10 + $0x1f8] sm:$0xff] }
 0x155   : > { %v2647_v43 = vpack.c.bf16 %v854_v37, %v852_v36  ;;  %v629_v59 = vld [vmem:[#allocation7 + $0x230] sm:$0xff]  ;;  %v2667_v23 = vpack.c.bf16 %v874_v22, %v872_v21  ;;  %v878_v28 = vld [vmem:[#allocation10 + $0x218] sm:$0xff]  ;;  %v1111_v32 = vld [vmem:[#allocation13 + $0x80] sm:$0xff] }
 0x156   : > { %2634 = vmatpush1.bf16.msra.mxu0 %v2633_v2  ;;  %v860_v29 = vld [vmem:[#allocation10 + $0x188] sm:$0xff]  ;;  %v2601_v0 = vpack.c.bf16 %v629_v59, %v625_v54  ;;  %v861_v4 = vld [vmem:[#allocation10 + $0x190] sm:$0xff]  ;;  %v1114_v37 = vld [vmem:[#allocation13 + $0x98] sm:$0xff] }
 0x157   : > { %2574 = vmatpush1.bf16.msra.mxu1 %v2573_v44  ;;  %2636 = vmatprep.subr.bf16.mxu0 %v2635_v5  ;;  %v851_v44 = vld [vmem:[#allocation10 + $0x140] sm:$0xff]  ;;  %v633_v1 = vld [vmem:[#allocation7 + $0x250] sm:$0xff]  ;;  %v2603_v5 = vpack.c.bf16 %v638_v62, %v634_v61 }
 0x158   : > { %2576 = vmatprep.subr.bf16.mxu1 %v2575_v49  ;;  %v858_v49 = vld [vmem:[#allocation10 + $0x178] sm:$0xff]  ;;  %v2649_v52 = vpack.c.bf16 %v853_v45, %v851_v44  ;;  %v637_v6 = vld [vmem:[#allocation7 + $0x270] sm:$0xff]  ;;  %v1119_v54 = vld [vmem:[#allocation13 + $0xc0] sm:$0xff] }
 0x159   : > { %v2651_v55 = vpack.c.bf16 %v858_v49, %v856_v48  ;;  %v2605_v10 = vpack.c.bf16 %v637_v6, %v633_v1  ;;  %v865_v13 = vld [vmem:[#allocation10 + $0x1b0] sm:$0xff]  ;;  %v1118_v49 = vld [vmem:[#allocation13 + $0xb8] sm:$0xff]  ;;  %v1123_v1 = vld [vmem:[#allocation13 + $0xe0] sm:$0xff] }
 0x15a   : > { %2638 = vmatpush1.bf16.msra.mxu0 %v2637_v14  ;;  %v868_v14 = vld [vmem:[#allocation10 + $0x1c8] sm:$0xff]  ;;  %v2661_v16 = vpack.c.bf16 %v865_v13, %v863_v12  ;;  %v869_v19 = vld [vmem:[#allocation10 + $0x1d0] sm:$0xff] }
 0x15b   : > { %2578 = vmatpush1.bf16.msra.mxu1 %v2577_v56  ;;  %2640 = vmatprep.subr.bf16.mxu0 %v2639_v17  ;;  %v855_v56 = vld [vmem:[#allocation10 + $0x160] sm:$0xff]  ;;  %v873_v25 = vld [vmem:[#allocation10 + $0x1f0] sm:$0xff] }
 0x15c   : > { %2580 = vmatprep.subr.bf16.mxu1 %v2579_v60  ;;  %v862_v60 = vld [vmem:[#allocation10 + $0x198] sm:$0xff]  ;;  %v2653_v63 = vpack.c.bf16 %v857_v57, %v855_v56  ;;  %v1112_v33 = vld [vmem:[#allocation13 + $0x88] sm:$0xff] }
 0x15d   : > { %v2655_v2 = vpack.c.bf16 %v862_v60, %v860_v29  ;;  %v1096_v35 = vld [vmem:[#allocation13 + $0x8] sm:$0xff]  ;;  %v1113_v36 = vld [vmem:[#allocation13 + $0x90] sm:$0xff]  ;;  %v1122_v60 = vld [vmem:[#allocation13 + $0xd8] sm:$0xff] }
 0x15e   : > { %2642 = vmatpush1.bf16.msra.mxu0 %v2641_v26  ;;  %v2669_v26 = vpack.c.bf16 %v873_v25, %v871_v24  ;;  %v2739_v39 = vpack.c.bf16 %v1114_v37, %v1113_v36  ;;  %v1100_v47 = vld [vmem:[#allocation13 + $0x28] sm:$0xff]  ;;  %v1117_v48 = vld [vmem:[#allocation13 + $0xb0] sm:$0xff]  ;;  %v879_v24 = vld [vmem:[#allocation10 + $0x220] sm:$0xff] }
 0x15f   : > { %2582 = vmatpush1.bf16.msra.mxu1 %v2581_v3  ;;  %2644 = vmatprep.subr.bf16.mxu0 %v2643_v31  ;;  %v859_v3 = vld [vmem:[#allocation10 + $0x180] sm:$0xff]  ;;  %v2747_v51 = vpack.c.bf16 %v1118_v49, %v1117_v48  ;;  %v1104_v59 = vld [vmem:[#allocation13 + $0x48] sm:$0xff]  ;;  %v1121_v29 = vld [vmem:[#allocation13 + $0xd0] sm:$0xff] }
 0x160   : > { %2584 = vmatprep.subr.bf16.mxu1 %v2583_v8  ;;  %v866_v8 = vld [vmem:[#allocation10 + $0x1b8] sm:$0xff]  ;;  %v2657_v9 = vpack.c.bf16 %v861_v4, %v859_v3  ;;  %v2755_v62 = vpack.c.bf16 %v1122_v60, %v1121_v29  ;;  %v881_v25 = vld [vmem:[#allocation10 + $0x230] sm:$0xff]  ;;  %v887_v37 = vld [vmem:[#allocation10 + $0x260] sm:$0xff] }
 0x161   : > { %v2659_v11 = vpack.c.bf16 %v866_v8, %v864_v7  ;;  %v3959_v8 = vld [vmem:[#allocation9] sm:$0xf]  ;;  %v895_v49 = vld [vmem:[#allocation10 + $0x2a0] sm:$0xff] }
 0x162   : > { %2646 = vmatpush1.bf16.msra.mxu0 %v2645_v40  ;;  %v1097_v40 = vld [vmem:[#allocation13 + $0x10] sm:$0xff]  ;;  %v903_v60 = vld [vmem:[#allocation10 + $0x2e0] sm:$0xff] }
 0x163   : > { %2586 = vmatpush1.bf16.msra.mxu1 %v2585_v15  ;;  %2648 = vmatprep.subr.bf16.mxu0 %v2647_v43  ;;  %v870_v15 = vld [vmem:[#allocation10 + $0x1d8] sm:$0xff]  ;;  %v1116_v43 = vld [vmem:[#allocation13 + $0xa8] sm:$0xff] }
 0x164   : > { %2588 = vmatprep.subr.bf16.mxu1 %v2587_v20  ;;  %v2663_v17 = vpack.c.bf16 %v870_v15, %v868_v14  ;;  %v2665_v20 = vpack.c.bf16 %v869_v19, %v867_v18  ;;  %v2743_v45 = vpack.c.bf16 %v1116_v43, %v1115_v42  ;;  %v875_v15 = vld [vmem:[#allocation10 + $0x200] sm:$0xff]  ;;  %v880_v18 = vld [vmem:[#allocation10 + $0x228] sm:$0xff]  ;;  %v882_v19 = vld [vmem:[#allocation10 + $0x238] sm:$0xff] }
 0x165   : > { %v891_v43 = vld [vmem:[#allocation10 + $0x280] sm:$0xff] }
 0x166   : > { %2650 = vmatpush1.bf16.msra.mxu0 %v2649_v52  ;;  %v1101_v52 = vld [vmem:[#allocation13 + $0x30] sm:$0xff] }
 0x167   : > { %2590 = vmatpush1.bf16.msra.mxu1 %v2589_v27  ;;  %2652 = vmatprep.subr.bf16.mxu0 %v2651_v55  ;;  %v876_v27 = vld [vmem:[#allocation10 + $0x208] sm:$0xff] }
 0x168   : > { %2592 = vmatprep.subr.bf16.mxu1 %v2591_v34  ;;  %v2671_v31 = vpack.c.bf16 %v878_v28, %v876_v27  ;;  %v1095_v34 = vld [vmem:[#allocation13] sm:$0xff]  ;;  %v1120_v55 = vld [vmem:[#allocation13 + $0xc8] sm:$0xff]  ;;  %v886_v27 = vld [vmem:[#allocation10 + $0x258] sm:$0xff]  ;;  %v2677_v28 = vpack.c.bf16 %v881_v25, %v879_v24 }
 0x169   : > { %v2737_v38 = vpack.c.bf16 %v1096_v35, %v1095_v34  ;;  %v2751_v57 = vpack.c.bf16 %v1120_v55, %v1119_v54  ;;  %v888_v34 = vld [vmem:[#allocation10 + $0x268] sm:$0xff]  ;;  %v899_v55 = vld [vmem:[#allocation10 + $0x2c0] sm:$0xff]  ;;  %v922_v25 = vld [vmem:[#allocation10 + $0x378] sm:$0xff] }
 0x16a   : > { %2654 = vmatpush1.bf16.msra.mxu0 %v2653_v63  ;;  %v1105_v63 = vld [vmem:[#allocation13 + $0x50] sm:$0xff]  ;;  %v920_v24 = vld [vmem:[#allocation10 + $0x368] sm:$0xff] }
 0x16b   : > { %2594 = vmatpush1.bf16.msra.mxu1 %v2593_v41  ;;  %2656 = vmatprep.subr.bf16.mxu0 %v2655_v2  ;;  %v1098_v41 = vld [vmem:[#allocation13 + $0x18] sm:$0xff]  ;;  %v1124_v2 = vld [vmem:[#allocation13 + $0xe8] sm:$0xff] }
 0x16c   : > { %2596 = vmatprep.subr.bf16.mxu1 %v2595_v46  ;;  %v2741_v44 = vpack.c.bf16 %v1098_v41, %v1097_v40  ;;  %v1099_v46 = vld [vmem:[#allocation13 + $0x20] sm:$0xff]  ;;  %v2759_v4 = vpack.c.bf16 %v1124_v2, %v1123_v1  ;;  %v894_v40 = vld [vmem:[#allocation10 + $0x298] sm:$0xff] }
 0x16d   : > { %v2745_v50 = vpack.c.bf16 %v1100_v47, %v1099_v46  ;;  %v898_v46 = vld [vmem:[#allocation10 + $0x2b8] sm:$0xff]  ;;  %v907_v2 = vld [vmem:[#allocation10 + $0x300] sm:$0xff] }
 0x16e   : > { %2658 = vmatpush1.bf16.msra.mxu0 %v2657_v9 }
 0x16f   : > { %2598 = vmatpush1.bf16.msra.mxu1 %v2597_v53  ;;  %2660 = vmatprep.subr.bf16.mxu0 %v2659_v11  ;;  %v1102_v53 = vld [vmem:[#allocation13 + $0x38] sm:$0xff] }
 0x170   : > { %2600 = vmatprep.subr.bf16.mxu1 %v2599_v58  ;;  %v2749_v56 = vpack.c.bf16 %v1102_v53, %v1101_v52  ;;  %v1103_v58 = vld [vmem:[#allocation13 + $0x40] sm:$0xff]  ;;  %v902_v52 = vld [vmem:[#allocation10 + $0x2d8] sm:$0xff] }
 0x171   : > { %v2753_v61 = vpack.c.bf16 %v1104_v59, %v1103_v58  ;;  %v906_v58 = vld [vmem:[#allocation10 + $0x2f8] sm:$0xff] }
 0x172   : > { %2662 = vmatpush1.bf16.msra.mxu0 %v2661_v16  ;;  %v877_v16 = vld [vmem:[#allocation10 + $0x210] sm:$0xff] }
 0x173   : > { %2602 = vmatpush1.bf16.msra.mxu1 %v2601_v0  ;;  %2664 = vmatprep.subr.bf16.mxu0 %v2663_v17  ;;  %v1106_v0 = vld [vmem:[#allocation13 + $0x58] sm:$0xff]  ;;  %v2673_v21 = vpack.c.bf16 %v877_v16, %v875_v15  ;;  %v916_v15 = vld [vmem:[#allocation10 + $0x348] sm:$0xff] }
 0x174   : > { %2604 = vmatprep.subr.bf16.mxu1 %v2603_v5  ;;  %v2757_v3 = vpack.c.bf16 %v1106_v0, %v1105_v63  ;;  %v641_v5 = vlaneseq  ;;  %v910_v63 = vld [vmem:[#allocation10 + $0x318] sm:$0xff] }
 0x175   : > { %v918_v16 = vld [vmem:[#allocation10 + $0x358] sm:$0xff] }
 0x176   : > { %2666 = vmatpush1.bf16.msra.mxu0 %v2665_v20  ;;  %v3956_v6 = vshrl.u32 %v641_v5, 7  ;;  %v914_v5 = vld [vmem:[#allocation10 + $0x338] sm:$0xff] }
 0x177   : > { %2606 = vmatpush1.bf16.msra.mxu1 %v2605_v10  ;;  %2668 = vmatprep.subr.bf16.mxu0 %v2667_v23  ;;  %v2675_v23 = vpack.c.bf16 %v882_v19, %v880_v18 }
 0x178   : > { %v643_v7 = vsub.s32 0, %v3956_v6  ;;  %v647_v9 = vsub.s32 1, %v3956_v6 }
 0x17a   : > { %801 = vmatmul.mubr.f32.vlgmr.msra.gmra.mrb[2].mxu1 %v3950_v30  ;;  %2670 = vmatpush1.bf16.msra.mxu0 %v2669_v26  ;;  %v2735_v30 = vpack.c.bf16 %v1112_v33, %v1111_v32  ;;  %v644_v10 = vrot.slane %v3959_v8, %v643_v7  ;;  %v648_v11 = vrot.slane %v3959_v8, %v647_v9  ;;  %v884_v26 = vld [vmem:[#allocation10 + $0x248] sm:$0xff]  ;;  %v883_v32 = vld [vmem:[#allocation10 + $0x240] sm:$0xff]  ;;  %v885_v33 = vld [vmem:[#allocation10 + $0x250] sm:$0xff] }
 0x17b   : > { %2672 = vmatprep.subr.bf16.mxu0 %v2671_v31  ;;  %v2679_v31 = vpack.c.bf16 %v886_v27, %v884_v26  ;;  %v2681_v35 = vpack.c.bf16 %v885_v33, %v883_v32  ;;  %v919_v32 = vld [vmem:[#allocation10 + $0x360] sm:$0xff]  ;;  %v921_v33 = vld [vmem:[#allocation10 + $0x370] sm:$0xff] }
 0x17c   : > { %2736 = vmatprep.subr.bf16.mxu1 %v2735_v30  ;;  %v890_v30 = vld [vmem:[#allocation10 + $0x278] sm:$0xff] }
 0x17d   : > { %2738 = vmatpush3.bf16.msra.mxu1 %v2737_v38  ;;  %v2683_v36 = vpack.c.bf16 %v890_v30, %v888_v34  ;;  %v889_v38 = vld [vmem:[#allocation10 + $0x270] sm:$0xff]  ;;  %v924_v34 = vld [vmem:[#allocation10 + $0x388] sm:$0xff]  ;;  %v926_v30 = vld [vmem:[#allocation10 + $0x398] sm:$0xff] }
 0x17e   : > { %2740 = vmatprep.subr.bf16.mxu1 %v2739_v39  ;;  %v892_v39 = vld [vmem:[#allocation10 + $0x288] sm:$0xff]  ;;  %v2685_v41 = vpack.c.bf16 %v889_v38, %v887_v37  ;;  %v923_v37 = vld [vmem:[#allocation10 + $0x380] sm:$0xff]  ;;  %v925_v38 = vld [vmem:[#allocation10 + $0x390] sm:$0xff] }
 0x17f   : > { %v2687_v42 = vpack.c.bf16 %v894_v40, %v892_v39  ;;  %v928_v39 = vld [vmem:[#allocation10 + $0x3a8] sm:$0xff]  ;;  %v930_v40 = vld [vmem:[#allocation10 + $0x3b8] sm:$0xff] }
 0x181   : > { %2742 = vmatpush3.bf16.msra.mxu1 %v2741_v44  ;;  %v893_v44 = vld [vmem:[#allocation10 + $0x290] sm:$0xff] }
 0x182   : > { %2744 = vmatprep.subr.bf16.mxu1 %v2743_v45  ;;  %v896_v45 = vld [vmem:[#allocation10 + $0x2a8] sm:$0xff]  ;;  %v2689_v47 = vpack.c.bf16 %v893_v44, %v891_v43  ;;  %v927_v43 = vld [vmem:[#allocation10 + $0x3a0] sm:$0xff]  ;;  %v929_v44 = vld [vmem:[#allocation10 + $0x3b0] sm:$0xff] }
 0x183   : > { %v2691_v48 = vpack.c.bf16 %v898_v46, %v896_v45  ;;  %v932_v45 = vld [vmem:[#allocation10 + $0x3c8] sm:$0xff]  ;;  %v934_v46 = vld [vmem:[#allocation10 + $0x3d8] sm:$0xff] }
 0x185   : > { %2746 = vmatpush3.bf16.msra.mxu1 %v2745_v50  ;;  %v897_v50 = vld [vmem:[#allocation10 + $0x2b0] sm:$0xff] }
 0x186   : > { %2748 = vmatprep.subr.bf16.mxu1 %v2747_v51  ;;  %v900_v51 = vld [vmem:[#allocation10 + $0x2c8] sm:$0xff]  ;;  %v2693_v53 = vpack.c.bf16 %v897_v50, %v895_v49  ;;  %v2727_v49 = vpack.c.bf16 %v934_v46, %v932_v45  ;;  %v931_v50 = vld [vmem:[#allocation10 + $0x3c0] sm:$0xff] }
 0x187   : > { %v2695_v54 = vpack.c.bf16 %v902_v52, %v900_v51  ;;  %v933_v51 = vld [vmem:[#allocation10 + $0x3d0] sm:$0xff]  ;;  %v936_v52 = vld [vmem:[#allocation10 + $0x3e8] sm:$0xff] }
 0x189   : > { %2750 = vmatpush3.bf16.msra.mxu1 %v2749_v56  ;;  %v901_v56 = vld [vmem:[#allocation10 + $0x2d0] sm:$0xff] }
 0x18a   : > { %2752 = vmatprep.subr.bf16.mxu1 %v2751_v57  ;;  %v904_v57 = vld [vmem:[#allocation10 + $0x2e8] sm:$0xff]  ;;  %v2697_v59 = vpack.c.bf16 %v901_v56, %v899_v55 }
 0x18b   : > { %v2699_v29 = vpack.c.bf16 %v906_v58, %v904_v57  ;;  %v935_v57 = vld [vmem:[#allocation10 + $0x3e0] sm:$0xff]  ;;  %v937_v58 = vld [vmem:[#allocation10 + $0x3f0] sm:$0xff] }
 0x18d   : > { %2754 = vmatpush3.bf16.msra.mxu1 %v2753_v61  ;;  %v905_v61 = vld [vmem:[#allocation10 + $0x2f0] sm:$0xff] }
 0x18e   : > { %2756 = vmatprep.subr.bf16.mxu1 %v2755_v62  ;;  %v908_v62 = vld [vmem:[#allocation10 + $0x308] sm:$0xff]  ;;  %v2701_v0 = vpack.c.bf16 %v905_v61, %v903_v60 }
 0x18f   : > { %v2703_v1 = vpack.c.bf16 %v910_v63, %v908_v62  ;;  %v1107_v61 = vld [vmem:[#allocation13 + $0x60] sm:$0xff]  ;;  %v1108_v62 = vld [vmem:[#allocation13 + $0x68] sm:$0xff] }
 0x190   : > { %v2761_v63 = vpack.c.bf16 %v1108_v62, %v1107_v61 }
 0x191   : > { %2758 = vmatpush3.bf16.msra.mxu1 %v2757_v3  ;;  %v909_v3 = vld [vmem:[#allocation10 + $0x310] sm:$0xff] }
 0x192   : > { %2760 = vmatprep.subr.bf16.mxu1 %v2759_v4  ;;  %v912_v4 = vld [vmem:[#allocation10 + $0x328] sm:$0xff] }
 0x195   : > { %2762 = vmatpush3.bf16.msra.mxu1 %v2761_v63 }
 0x225   : > { %v731_v12 = vpop.f32.mrb[0].mxu1 }
 0x226   : > { %v732_v13 = vadd.f32 %v731_v12, %v644_v10  ;;  %v733_v14 = vpop.f32.mrb[1].mxu1  ;;  %v655_v10 = vsub.s32 3, %v3956_v6  ;;  %v2707_v12 = vpack.c.bf16 %v914_v5, %v912_v4  ;;  %v939_v5 = vld [vmem:[#allocation12] sm:$0x3] }
 0x227   : > { %v734_v17 = vadd.f32 %v733_v14, %v648_v11  ;;  %v2705_v11 = vpack.c.bf16 %v909_v3, %v907_v2  ;;  %v913_v14 = vld [vmem:[#allocation10 + $0x330] sm:$0xff] }
 0x228   : > { %v807_v22 = vmax.f32 %v732_v13, 0.0  ;;  %v911_v13 = vld [vmem:[#allocation10 + $0x320] sm:$0xff]  ;;  %v1109_v3 = vld [vmem:[#allocation13 + $0x70] sm:$0xff] }
 0x229   : > { %v808_v20 = vmax.f32 %v734_v17, 0.0  ;;  %v656_v17 = vrot.slane %v3959_v8, %v655_v10  ;;  %v2709_v18 = vpack.c.bf16 %v913_v14, %v911_v13  ;;  %v944_v10 = vrot.slane %v939_v5, %v643_v7 }
 0x22b   : > { %1015 = vmatprep.mubr.f32.mxu0 %v808_v20  ;;  %v2711_v20 = vpack.c.bf16 %v918_v16, %v916_v15 }
 0x22c   : > { %1016 = vmatmul.mubr.f32.vlgmr.msra.gmra.mrb[0].mxu0 %v807_v22  ;;  %v917_v22 = vld [vmem:[#allocation10 + $0x350] sm:$0xff] }
 0x22d   : > { %2674 = vmatpush1.bf16.msra.mxu0 %v2673_v21  ;;  %v915_v21 = vld [vmem:[#allocation10 + $0x340] sm:$0xff] }
 0x22e   : > { %2676 = vmatprep.subr.bf16.mxu0 %v2675_v23  ;;  %v2713_v27 = vpack.c.bf16 %v917_v22, %v915_v21  ;;  %v2485_v21 = vld [vmem:[#allocation15] ss:$0 sm:$0xff] }
 0x231   : > { %2678 = vmatpush1.bf16.msra.mxu0 %v2677_v28 }
 0x232   : > { %2680 = vmatprep.subr.bf16.mxu0 %v2679_v31  ;;  %v2715_v31 = vpack.c.bf16 %v922_v25, %v920_v24 }
 0x235   : > { %2682 = vmatpush1.bf16.msra.mxu0 %v2681_v35  ;;  %v2717_v35 = vpack.c.bf16 %v921_v33, %v919_v32 }
 0x236   : > { %2684 = vmatprep.subr.bf16.mxu0 %v2683_v36  ;;  %v2719_v36 = vpack.c.bf16 %v926_v30, %v924_v34 }
 0x239   : > { %2686 = vmatpush1.bf16.msra.mxu0 %v2685_v41  ;;  %v2721_v41 = vpack.c.bf16 %v925_v38, %v923_v37 }
 0x23a   : > { %2688 = vmatprep.subr.bf16.mxu0 %v2687_v42  ;;  %v2723_v42 = vpack.c.bf16 %v930_v40, %v928_v39 }
 0x23d   : > { %2690 = vmatpush1.bf16.msra.mxu0 %v2689_v47  ;;  %v2725_v47 = vpack.c.bf16 %v929_v44, %v927_v43 }
 0x23e   : > { %2692 = vmatprep.subr.bf16.mxu0 %v2691_v48  ;;  %v651_v48 = vsub.s32 2, %v3956_v6 }
 0x240   : > { %v652_v55 = vrot.slane %v3959_v8, %v651_v48  ;;  %v1110_v8 = vld [vmem:[#allocation13 + $0x78] sm:$0xff] }
 0x241   : > { %2694 = vmatpush1.bf16.msra.mxu0 %v2693_v53  ;;  %v938_v53 = vld [vmem:[#allocation10 + $0x3f8] sm:$0xff]  ;;  %v2765_v4 = vpack.c.bf16 %v1110_v8, %v1109_v3 }
 0x242   : > { %2696 = vmatprep.subr.bf16.mxu0 %v2695_v54  ;;  %v2729_v54 = vpack.c.bf16 %v933_v51, %v931_v50  ;;  %v2731_v56 = vpack.c.bf16 %v938_v53, %v936_v52 }
 0x245   : > { %2698 = vmatpush1.bf16.msra.mxu0 %v2697_v59  ;;  %v2733_v59 = vpack.c.bf16 %v937_v58, %v935_v57 }
 0x246   : > { %2700 = vmatprep.subr.bf16.mxu0 %v2699_v29 }
 0x249   : > { %2702 = vmatpush1.bf16.msra.mxu0 %v2701_v0  ;;  %v1125_v0 = vld [vmem:[#allocation13 + $0xf0] sm:$0xff] }
 0x24a   : > { %2704 = vmatprep.subr.bf16.mxu0 %v2703_v1  ;;  %v1126_v1 = vld [vmem:[#allocation13 + $0xf8] sm:$0xff] }
 0x24b   : > { %v2763_v2 = vpack.c.bf16 %v1126_v1, %v1125_v0 }
 0x24d   : > { %2706 = vmatpush1.bf16.msra.mxu0 %v2705_v11  ;;  %v802_v19 = vpop.f32.mrb[2].mxu1  ;;  %2764 = vmatprep.subr.bf16.mxu1 %v2763_v2  ;;  %v948_v11 = vrot.slane %v939_v5, %v647_v9 }
 0x24e   : > { %2708 = vmatprep.subr.bf16.mxu0 %v2707_v12  ;;  %v804_v23 = vpop.f32.mrb[3].mxu1  ;;  %v803_v29 = vadd.f32 %v802_v19, %v652_v55  ;;  %2766 = vmatpush3.bf16.msra.mxu1 %v2765_v4  ;;  %v3549_v19 = vmov 0.0  }
 0x24f   : > { %v805_v26 = vadd.f32 %v804_v23, %v656_v17  ;;  %1208 = vst.msk [vmem:[#allocation4] sm:$0xff] %vm1206_vm1, %v3549_v19 }
 0x250   : > { %v809_v60 = vmax.f32 %v803_v29, 0.0 }
 0x251   : > { %2710 = vmatpush1.bf16.msra.mxu0 %v2709_v18  ;;  %v810_v28 = vmax.f32 %v805_v26, 0.0  ;;  %v3548_v18 = vmov -inf  }
 0x252   : > { %2712 = vmatprep.subr.bf16.mxu0 %v2711_v20  ;;  %1207 = vst.msk [vmem:[#allocation3] sm:$0xff] %vm1206_vm1, %v3548_v18 }
 0x253   : > { %1086 = vmatprep.mubr.f32.mxu0 %v810_v28 }
 0x255   : > { %2714 = vmatpush1.bf16.msra.mxu0 %v2713_v27 }
 0x256   : > { %2716 = vmatprep.subr.bf16.mxu0 %v2715_v31 }
 0x259   : > { %2718 = vmatpush1.bf16.msra.mxu0 %v2717_v35 }
 0x25a   : > { %2720 = vmatprep.subr.bf16.mxu0 %v2719_v36 }
 0x25d   : > { %2722 = vmatpush1.bf16.msra.mxu0 %v2721_v41 }
 0x25e   : > { %2724 = vmatprep.subr.bf16.mxu0 %v2723_v42 }
 0x261   : > { %2726 = vmatpush1.bf16.msra.mxu0 %v2725_v47 }
 0x262   : > { %2728 = vmatprep.subr.bf16.mxu0 %v2727_v49 }
 0x265   : > { %2730 = vmatpush1.bf16.msra.mxu0 %v2729_v54 }
 0x266   : > { %2732 = vmatprep.subr.bf16.mxu0 %v2731_v56 }
 0x269   : > { %2734 = vmatpush1.bf16.msra.mxu0 %v2733_v59 }
 0x26c   : > { %1087 = vmatmul.mubr.f32.vlgmr.msra.gmra.mrb[0].mxu0 %v809_v60 }
 0x33f   : > { %v1088_v12 = vpop.f32.mrb[0].mxu0 }
 0x340   : > { %v3023_v13 = vadd.f32 %v1088_v12, %v944_v10  ;;  %v1090_v14 = vpop.f32.mrb[1].mxu0 }
 0x341   : > { %v3024_v15 = vadd.f32 %v1090_v14, %v948_v11 }
 0x342   : > { %v1093_v17 = vmax.f32 %v3023_v13, 0.0 }
 0x343   : > { %v1094_v16 = vmax.f32 %v3024_v15, 0.0 }
 0x345   : > { %1198 = vmatprep.mubr.f32.mxu1 %v1094_v16 }
 0x346   : > { %1199 = vmatmul.mubr.f32.vlgmr.msra.gmra.mrb[4].mxu1 %v1093_v17 }
 0x419   : > { %v2524_v20 = vpop.f32.mrb[4].mxu1 }
 0x41a   : > { %v2525_v22 = vpop.f32.mrb[5].mxu1 }
 0x41b   : > { %v2526_v7 = vadd.f32 %v2525_v22, %v2524_v20 }
 0x41d   : > { %v1201_v23 = vadd.f32 %v2526_v7, %v2485_v21 }
 0x41f   : > { %v1204_v6 = vmax.f32 %v1201_v23, 0.0 }
 0x421   : > { %1205 = vst [vmem:[#allocation2] sm:$0xff] %v1204_v6 }
 0x422 PF: > { %v1211_v9 = vld [vmem:[%s3930_s1 + $0x8] sm:$0xff]  ;;  %v1213_v25 = vld [vmem:[%s3930_s1 + $0x18] sm:$0xff]  ;;  %v1210_v28 = vld [vmem:[%s3930_s1] sm:$0xff]  ;;  %v3550_v32 = vmov 0.0   ;;  %vm2229_vm2 = vcmask 7168   ;;  %s4456_s28 = sld [smem:[#allocation24_spill]] }
 0x423   : > { %v1227_v24 = vld [vmem:[%s3930_s1 + $0x88] sm:$0xff]  ;;  %v1229_v27 = vld [vmem:[%s3930_s1 + $0x98] sm:$0xff]  ;;  %v1226_v31 = vld [vmem:[%s3930_s1 + $0x80] sm:$0xff]  ;;  %1614 = vmatprep.mubr.f32.mxu0 %v3550_v32  ;;  %1685 = vmatprep.mubr.f32.mxu1 %v3550_v32 }
 0x424   : > { %v2767_v26 = vpack.c.bf16 %v1227_v24, %v1211_v9  ;;  %v2799_v33 = vpack.c.bf16 %v1229_v27, %v1213_v25  ;;  %v2769_v34 = vpack.c.bf16 %v1226_v31, %v1210_v28  ;;  %v1212_v30 = vld [vmem:[%s3930_s1 + $0x10] sm:$0xff]  ;;  %v1243_v36 = vld [vmem:[%s3930_s1 + $0x108] sm:$0xff]  ;;  %v1245_v39 = vld [vmem:[%s3930_s1 + $0x118] sm:$0xff] }
 0x425   : > { %v1228_v35 = vld [vmem:[%s3930_s1 + $0x90] sm:$0xff]  ;;  %v1259_v38 = vld [vmem:[%s3930_s1 + $0x188] sm:$0xff]  ;;  %v1261_v40 = vld [vmem:[%s3930_s1 + $0x198] sm:$0xff] }
 0x426   : > { %2768 = vmatprep.subr.bf16.mxu0 %v2767_v26  ;;  %v2801_v37 = vpack.c.bf16 %v1228_v35, %v1212_v30  ;;  %2800 = vmatprep.subr.bf16.mxu1 %v2799_v33  ;;  %v2771_v41 = vpack.c.bf16 %v1259_v38, %v1243_v36  ;;  %v2803_v42 = vpack.c.bf16 %v1261_v40, %v1245_v39  ;;  %v1242_v43 = vld [vmem:[%s3930_s1 + $0x100] sm:$0xff]  ;;  %v1244_v45 = vld [vmem:[%s3930_s1 + $0x110] sm:$0xff]  ;;  %v1275_v48 = vld [vmem:[%s3930_s1 + $0x208] sm:$0xff] }
 0x427   : > { %2770 = vmatpush1.bf16.msra.mxu0 %v2769_v34  ;;  %v1258_v44 = vld [vmem:[%s3930_s1 + $0x180] sm:$0xff]  ;;  %v1260_v47 = vld [vmem:[%s3930_s1 + $0x190] sm:$0xff]  ;;  %v1291_v49 = vld [vmem:[%s3930_s1 + $0x288] sm:$0xff] }
 0x428   : > { %2802 = vmatpush1.bf16.msra.mxu1 %v2801_v37  ;;  %v2773_v46 = vpack.c.bf16 %v1258_v44, %v1242_v43  ;;  %2772 = vmatprep.subr.bf16.mxu0 %v2771_v41  ;;  %v2805_v50 = vpack.c.bf16 %v1260_v47, %v1244_v45  ;;  %v2775_v51 = vpack.c.bf16 %v1291_v49, %v1275_v48  ;;  %v1277_v52 = vld [vmem:[%s3930_s1 + $0x218] sm:$0xff]  ;;  %v1274_v54 = vld [vmem:[%s3930_s1 + $0x200] sm:$0xff]  ;;  %v1276_v57 = vld [vmem:[%s3930_s1 + $0x210] sm:$0xff]  ;;  %p2486_p1 = scmp.ne.s32.totalorder %s4456_s28, 8 }
 0x429   : > { %2804 = vmatprep.subr.bf16.mxu1 %v2803_v42  ;;  %v1293_v53 = vld [vmem:[%s3930_s1 + $0x298] sm:$0xff]  ;;  %v1290_v56 = vld [vmem:[%s3930_s1 + $0x280] sm:$0xff]  ;;  %v1292_v58 = vld [vmem:[%s3930_s1 + $0x290] sm:$0xff]  ;;  %s4457_s11 = sld [smem:[#allocation33_spill]] (!%p2486_p1) }
 0x42a   : > { %v2807_v55 = vpack.c.bf16 %v1293_v53, %v1277_v52  ;;  %v2777_v59 = vpack.c.bf16 %v1290_v56, %v1274_v54  ;;  %v1307_v29 = vld [vmem:[%s3930_s1 + $0x308] sm:$0xff]  ;;  %v1309_v61 = vld [vmem:[%s3930_s1 + $0x318] sm:$0xff]  ;;  %v2809_v62 = vpack.c.bf16 %v1292_v58, %v1276_v57  ;;  %v1306_v1 = vld [vmem:[%s3930_s1 + $0x300] sm:$0xff] }
 0x42b   : > { %2774 = vmatpush1.bf16.msra.mxu0 %v2773_v46  ;;  %v1323_v60 = vld [vmem:[%s3930_s1 + $0x388] sm:$0xff]  ;;  %v1325_v0 = vld [vmem:[%s3930_s1 + $0x398] sm:$0xff]  ;;  %v1322_v2 = vld [vmem:[%s3930_s1 + $0x380] sm:$0xff] }
 0x42c   : > { %2806 = vmatpush1.bf16.msra.mxu1 %v2805_v50  ;;  %2776 = vmatprep.subr.bf16.mxu0 %v2775_v51  ;;  %v2779_v63 = vpack.c.bf16 %v1323_v60, %v1307_v29  ;;  %v2811_v3 = vpack.c.bf16 %v1325_v0, %v1309_v61  ;;  %v1308_v8 = vld [vmem:[%s3930_s1 + $0x310] sm:$0xff]  ;;  %v1339_v5 = vld [vmem:[%s3930_s1 + $0x408] sm:$0xff]  ;;  %v1341_v11 = vld [vmem:[%s3930_s1 + $0x418] sm:$0xff]  ;;  %v2781_v13 = vpack.c.bf16 %v1322_v2, %v1306_v1 }
 0x42d   : > { %2808 = vmatprep.subr.bf16.mxu1 %v2807_v55  ;;  %v1324_v4 = vld [vmem:[%s3930_s1 + $0x390] sm:$0xff]  ;;  %v1355_v10 = vld [vmem:[%s3930_s1 + $0x488] sm:$0xff]  ;;  %v1357_v12 = vld [vmem:[%s3930_s1 + $0x498] sm:$0xff] }
 0x42e   : > { %v2813_v14 = vpack.c.bf16 %v1324_v4, %v1308_v8  ;;  %v2783_v15 = vpack.c.bf16 %v1355_v10, %v1339_v5  ;;  %v1338_v16 = vld [vmem:[%s3930_s1 + $0x400] sm:$0xff]  ;;  %v1340_v18 = vld [vmem:[%s3930_s1 + $0x410] sm:$0xff]  ;;  %v2815_v19 = vpack.c.bf16 %v1357_v12, %v1341_v11  ;;  %v1371_v21 = vld [vmem:[%s3930_s1 + $0x508] sm:$0xff] }
 0x42f   : > { %2778 = vmatpush1.bf16.msra.mxu0 %v2777_v59  ;;  %v1354_v17 = vld [vmem:[%s3930_s1 + $0x480] sm:$0xff]  ;;  %v1356_v20 = vld [vmem:[%s3930_s1 + $0x490] sm:$0xff]  ;;  %v1387_v22 = vld [vmem:[%s3930_s1 + $0x588] sm:$0xff] }
 0x430   : > { %2810 = vmatpush1.bf16.msra.mxu1 %v2809_v62  ;;  %2780 = vmatprep.subr.bf16.mxu0 %v2779_v63  ;;  %v1373_v7 = vld [vmem:[%s3930_s1 + $0x518] sm:$0xff]  ;;  %v2785_v6 = vpack.c.bf16 %v1354_v17, %v1338_v16  ;;  %v2817_v9 = vpack.c.bf16 %v1356_v20, %v1340_v18  ;;  %v2787_v24 = vpack.c.bf16 %v1387_v22, %v1371_v21  ;;  %v1370_v25 = vld [vmem:[%s3930_s1 + $0x500] sm:$0xff]  ;;  %v1372_v27 = vld [vmem:[%s3930_s1 + $0x510] sm:$0xff] }
 0x431   : > { %2812 = vmatprep.subr.bf16.mxu1 %v2811_v3  ;;  %v1389_v23 = vld [vmem:[%s3930_s1 + $0x598] sm:$0xff]  ;;  %v1386_v26 = vld [vmem:[%s3930_s1 + $0x580] sm:$0xff]  ;;  %v1388_v31 = vld [vmem:[%s3930_s1 + $0x590] sm:$0xff] }
 0x432   : > { %v2819_v28 = vpack.c.bf16 %v1389_v23, %v1373_v7  ;;  %v1403_v33 = vld [vmem:[%s3930_s1 + $0x608] sm:$0xff]  ;;  %v1405_v30 = vld [vmem:[%s3930_s1 + $0x618] sm:$0xff]  ;;  %v2789_v36 = vpack.c.bf16 %v1386_v26, %v1370_v25  ;;  %v2821_v37 = vpack.c.bf16 %v1388_v31, %v1372_v27  ;;  %v1402_v39 = vld [vmem:[%s3930_s1 + $0x600] sm:$0xff] }
 0x433   : > { %2782 = vmatpush1.bf16.msra.mxu0 %v2781_v13  ;;  %v1419_v34 = vld [vmem:[%s3930_s1 + $0x688] sm:$0xff]  ;;  %v1421_v35 = vld [vmem:[%s3930_s1 + $0x698] sm:$0xff]  ;;  %v1418_v40 = vld [vmem:[%s3930_s1 + $0x680] sm:$0xff] }
 0x434   : > { %2814 = vmatpush1.bf16.msra.mxu1 %v2813_v14  ;;  %2784 = vmatprep.subr.bf16.mxu0 %v2783_v15  ;;  %v2791_v38 = vpack.c.bf16 %v1419_v34, %v1403_v33  ;;  %v1404_v41 = vld [vmem:[%s3930_s1 + $0x610] sm:$0xff]  ;;  %v2823_v42 = vpack.c.bf16 %v1421_v35, %v1405_v30  ;;  %v1435_v44 = vld [vmem:[%s3930_s1 + $0x708] sm:$0xff]  ;;  %v1437_v46 = vld [vmem:[%s3930_s1 + $0x718] sm:$0xff]  ;;  %v2793_v48 = vpack.c.bf16 %v1418_v40, %v1402_v39 }
 0x435   : > { %2816 = vmatprep.subr.bf16.mxu1 %v2815_v19  ;;  %v1420_v43 = vld [vmem:[%s3930_s1 + $0x690] sm:$0xff]  ;;  %v1451_v45 = vld [vmem:[%s3930_s1 + $0x788] sm:$0xff]  ;;  %v1453_v47 = vld [vmem:[%s3930_s1 + $0x798] sm:$0xff] }
 0x436   : > { %v2825_v49 = vpack.c.bf16 %v1420_v43, %v1404_v41  ;;  %v2795_v50 = vpack.c.bf16 %v1451_v45, %v1435_v44  ;;  %v1434_v51 = vld [vmem:[%s3930_s1 + $0x700] sm:$0xff]  ;;  %v1436_v53 = vld [vmem:[%s3930_s1 + $0x710] sm:$0xff]  ;;  %v2827_v54 = vpack.c.bf16 %v1453_v47, %v1437_v46  ;;  %v1215_v56 = vld [vmem:[%s3930_s1 + $0x28] sm:$0xff] }
 0x437   : > { %2786 = vmatpush1.bf16.msra.mxu0 %v2785_v6  ;;  %v1450_v52 = vld [vmem:[%s3930_s1 + $0x780] sm:$0xff]  ;;  %v1452_v55 = vld [vmem:[%s3930_s1 + $0x790] sm:$0xff]  ;;  %v1231_v57 = vld [vmem:[%s3930_s1 + $0xa8] sm:$0xff] }
 0x438   : > { %2818 = vmatpush1.bf16.msra.mxu1 %v2817_v9  ;;  %2788 = vmatprep.subr.bf16.mxu0 %v2787_v24  ;;  %v1217_v58 = vld [vmem:[%s3930_s1 + $0x38] sm:$0xff]  ;;  %v2797_v29 = vpack.c.bf16 %v1450_v52, %v1434_v51  ;;  %v2829_v60 = vpack.c.bf16 %v1452_v55, %v1436_v53  ;;  %v2831_v61 = vpack.c.bf16 %v1231_v57, %v1215_v56  ;;  %v1214_v62 = vld [vmem:[%s3930_s1 + $0x20] sm:$0xff]  ;;  %v1216_v0 = vld [vmem:[%s3930_s1 + $0x30] sm:$0xff] }
 0x439   : > { %2820 = vmatprep.subr.bf16.mxu1 %v2819_v28  ;;  %v1233_v59 = vld [vmem:[%s3930_s1 + $0xb8] sm:$0xff]  ;;  %v1230_v63 = vld [vmem:[%s3930_s1 + $0xa0] sm:$0xff]  ;;  %v1232_v2 = vld [vmem:[%s3930_s1 + $0xb0] sm:$0xff] }
 0x43a   : > { %v2863_v1 = vpack.c.bf16 %v1233_v59, %v1217_v58  ;;  %v1247_v3 = vld [vmem:[%s3930_s1 + $0x128] sm:$0xff]  ;;  %v1249_v4 = vld [vmem:[%s3930_s1 + $0x138] sm:$0xff]  ;;  %v4054_v10 = vld [vmem:[#allocation2] sm:$0xff]  ;;  %v2833_v11 = vpack.c.bf16 %v1230_v63, %v1214_v62  ;;  %v2865_v12 = vpack.c.bf16 %v1232_v2, %v1216_v0 }
 0x43b   : > { %2790 = vmatpush1.bf16.msra.mxu0 %v2789_v36  ;;  %v1263_v8 = vld [vmem:[%s3930_s1 + $0x1a8] sm:$0xff]  ;;  %v1265_v5 = vld [vmem:[%s3930_s1 + $0x1b8] sm:$0xff]  ;;  %v1246_v14 = vld [vmem:[%s3930_s1 + $0x120] sm:$0xff] }
 0x43c   : > { %2822 = vmatpush1.bf16.msra.mxu1 %v2821_v37  ;;  %2792 = vmatprep.subr.bf16.mxu0 %v2791_v38  ;;  %v2835_v13 = vpack.c.bf16 %v1263_v8, %v1247_v3  ;;  %v1262_v15 = vld [vmem:[%s3930_s1 + $0x1a0] sm:$0xff]  ;;  %v1248_v16 = vld [vmem:[%s3930_s1 + $0x130] sm:$0xff]  ;;  %v2867_v17 = vpack.c.bf16 %v1265_v5, %v1249_v4  ;;  %v1279_v19 = vld [vmem:[%s3930_s1 + $0x228] sm:$0xff] }
 0x43d   : > { %2824 = vmatprep.subr.bf16.mxu1 %v2823_v42  ;;  %v1264_v18 = vld [vmem:[%s3930_s1 + $0x1b0] sm:$0xff]  ;;  %v1295_v20 = vld [vmem:[%s3930_s1 + $0x2a8] sm:$0xff]  ;;  %v1281_v21 = vld [vmem:[%s3930_s1 + $0x238] sm:$0xff]  ;;  %v2837_v7 = vpack.c.bf16 %v1262_v15, %v1246_v14 }
 0x43e   : > { %v1297_v22 = vld [vmem:[%s3930_s1 + $0x2b8] sm:$0xff]  ;;  %v2869_v23 = vpack.c.bf16 %v1264_v18, %v1248_v16  ;;  %v2839_v6 = vpack.c.bf16 %v1295_v20, %v1279_v19  ;;  %v1278_v9 = vld [vmem:[%s3930_s1 + $0x220] sm:$0xff]  ;;  %v1280_v25 = vld [vmem:[%s3930_s1 + $0x230] sm:$0xff] }
 0x43f   : > { %2794 = vmatpush1.bf16.msra.mxu0 %v2793_v48  ;;  %v1294_v24 = vld [vmem:[%s3930_s1 + $0x2a0] sm:$0xff]  ;;  %v2871_v26 = vpack.c.bf16 %v1297_v22, %v1281_v21  ;;  %v1296_v27 = vld [vmem:[%s3930_s1 + $0x2b0] sm:$0xff]  ;;  %v1311_v28 = vld [vmem:[%s3930_s1 + $0x328] sm:$0xff] }
 0x440   : > { %2826 = vmatpush1.bf16.msra.mxu1 %v2825_v49  ;;  %2796 = vmatprep.subr.bf16.mxu0 %v2795_v50  ;;  %v1327_v31 = vld [vmem:[%s3930_s1 + $0x3a8] sm:$0xff]  ;;  %v1313_v33 = vld [vmem:[%s3930_s1 + $0x338] sm:$0xff]  ;;  %v2841_v30 = vpack.c.bf16 %v1294_v24, %v1278_v9  ;;  %v2873_v35 = vpack.c.bf16 %v1296_v27, %v1280_v25  ;;  %v1310_v37 = vld [vmem:[%s3930_s1 + $0x320] sm:$0xff] }
 0x441   : > { %2828 = vmatprep.subr.bf16.mxu1 %v2827_v54  ;;  %v1329_v34 = vld [vmem:[%s3930_s1 + $0x3b8] sm:$0xff]  ;;  %v2843_v36 = vpack.c.bf16 %v1327_v31, %v1311_v28  ;;  %v1326_v38 = vld [vmem:[%s3930_s1 + $0x3a0] sm:$0xff]  ;;  %v1312_v39 = vld [vmem:[%s3930_s1 + $0x330] sm:$0xff] }
 0x442   : > { %v2875_v40 = vpack.c.bf16 %v1329_v34, %v1313_v33  ;;  %v1328_v41 = vld [vmem:[%s3930_s1 + $0x3b0] sm:$0xff]  ;;  %v1343_v42 = vld [vmem:[%s3930_s1 + $0x428] sm:$0xff]  ;;  %v1345_v44 = vld [vmem:[%s3930_s1 + $0x438] sm:$0xff]  ;;  %v2845_v46 = vpack.c.bf16 %v1326_v38, %v1310_v37 }
 0x443   : > { %2798 = vmatpush1.bf16.msra.mxu0 %v2797_v29  ;;  %v1359_v43 = vld [vmem:[%s3930_s1 + $0x4a8] sm:$0xff]  ;;  %v1361_v45 = vld [vmem:[%s3930_s1 + $0x4b8] sm:$0xff]  ;;  %v2877_v47 = vpack.c.bf16 %v1328_v41, %v1312_v39  ;;  %v1342_v49 = vld [vmem:[%s3930_s1 + $0x420] sm:$0xff] }
 0x444   : > { %2830 = vmatpush1.bf16.msra.mxu1 %v2829_v60  ;;  %2832 = vmatprep.subr.bf16.mxu0 %v2831_v61  ;;  %v2847_v48 = vpack.c.bf16 %v1359_v43, %v1343_v42  ;;  %v1358_v50 = vld [vmem:[%s3930_s1 + $0x4a0] sm:$0xff]  ;;  %v1344_v51 = vld [vmem:[%s3930_s1 + $0x430] sm:$0xff]  ;;  %v2879_v52 = vpack.c.bf16 %v1361_v45, %v1345_v44  ;;  %v1375_v54 = vld [vmem:[%s3930_s1 + $0x528] sm:$0xff] }
 0x445   : > { %2864 = vmatprep.subr.bf16.mxu1 %v2863_v1  ;;  %v1360_v53 = vld [vmem:[%s3930_s1 + $0x4b0] sm:$0xff]  ;;  %v1391_v55 = vld [vmem:[%s3930_s1 + $0x5a8] sm:$0xff]  ;;  %v1377_v56 = vld [vmem:[%s3930_s1 + $0x538] sm:$0xff]  ;;  %v2849_v58 = vpack.c.bf16 %v1358_v50, %v1342_v49 }
 0x446   : > { %1615 = vmatmul.mubr.f32.vlgmr.msra.gmra.mrb[0].mxu0 %v4054_v10  ;;  %v1393_v57 = vld [vmem:[%s3930_s1 + $0x5b8] sm:$0xff]  ;;  %v2881_v59 = vpack.c.bf16 %v1360_v53, %v1344_v51  ;;  %v2851_v29 = vpack.c.bf16 %v1391_v55, %v1375_v54  ;;  %v1374_v60 = vld [vmem:[%s3930_s1 + $0x520] sm:$0xff]  ;;  %v1376_v62 = vld [vmem:[%s3930_s1 + $0x530] sm:$0xff] }
 0x447   : > { %1686 = vmatmul.mubr.f32.vlgmr.msra.gmra.mrb[0].mxu1 %v4054_v10  ;;  %2834 = vmatpush1.bf16.msra.mxu0 %v2833_v11  ;;  %v1390_v61 = vld [vmem:[%s3930_s1 + $0x5a0] sm:$0xff]  ;;  %v2883_v63 = vpack.c.bf16 %v1393_v57, %v1377_v56  ;;  %v1392_v0 = vld [vmem:[%s3930_s1 + $0x5b0] sm:$0xff]  ;;  %v1407_v1 = vld [vmem:[%s3930_s1 + $0x628] sm:$0xff] }
 0x448   : > { %2866 = vmatpush1.bf16.msra.mxu1 %v2865_v12  ;;  %2836 = vmatprep.subr.bf16.mxu0 %v2835_v13  ;;  %v1423_v2 = vld [vmem:[%s3930_s1 + $0x6a8] sm:$0xff]  ;;  %v1409_v3 = vld [vmem:[%s3930_s1 + $0x638] sm:$0xff]  ;;  %v2853_v4 = vpack.c.bf16 %v1390_v61, %v1374_v60  ;;  %v2885_v5 = vpack.c.bf16 %v1392_v0, %v1376_v62  ;;  %v1406_v12 = vld [vmem:[%s3930_s1 + $0x620] sm:$0xff] }
 0x449   : > { %2868 = vmatprep.subr.bf16.mxu1 %v2867_v17  ;;  %1756 = vmatprep.mubr.f32.mxu0 %v3550_v32  ;;  %v1425_v8 = vld [vmem:[%s3930_s1 + $0x6b8] sm:$0xff]  ;;  %v2855_v11 = vpack.c.bf16 %v1423_v2, %v1407_v1  ;;  %v1422_v13 = vld [vmem:[%s3930_s1 + $0x6a0] sm:$0xff]  ;;  %v1408_v14 = vld [vmem:[%s3930_s1 + $0x630] sm:$0xff] }
 0x44a   : > { %1827 = vmatprep.mubr.f32.mxu1 %v3550_v32  ;;  %v2887_v15 = vpack.c.bf16 %v1425_v8, %v1409_v3  ;;  %v1424_v16 = vld [vmem:[%s3930_s1 + $0x6b0] sm:$0xff]  ;;  %v1439_v17 = vld [vmem:[%s3930_s1 + $0x728] sm:$0xff]  ;;  %v1441_v19 = vld [vmem:[%s3930_s1 + $0x738] sm:$0xff]  ;;  %v2857_v21 = vpack.c.bf16 %v1422_v13, %v1406_v12 }
 0x44b   : > { %2838 = vmatpush1.bf16.msra.mxu0 %v2837_v7  ;;  %v1455_v18 = vld [vmem:[%s3930_s1 + $0x7a8] sm:$0xff]  ;;  %v1457_v20 = vld [vmem:[%s3930_s1 + $0x7b8] sm:$0xff]  ;;  %v2889_v22 = vpack.c.bf16 %v1424_v16, %v1408_v14  ;;  %v1440_v9 = vld [vmem:[%s3930_s1 + $0x730] sm:$0xff] }
 0x44c   : > { %2870 = vmatpush1.bf16.msra.mxu1 %v2869_v23  ;;  %2840 = vmatprep.subr.bf16.mxu0 %v2839_v6  ;;  %v2859_v7 = vpack.c.bf16 %v1455_v18, %v1439_v17  ;;  %v1438_v23 = vld [vmem:[%s3930_s1 + $0x720] sm:$0xff]  ;;  %v2891_v24 = vpack.c.bf16 %v1457_v20, %v1441_v19  ;;  %v1456_v25 = vld [vmem:[%s3930_s1 + $0x7b0] sm:$0xff]  ;;  %v1235_v27 = vld [vmem:[%s3930_s1 + $0xc8] sm:$0xff] }
 0x44d   : > { %2872 = vmatprep.subr.bf16.mxu1 %v2871_v26  ;;  %v1454_v6 = vld [vmem:[%s3930_s1 + $0x7a0] sm:$0xff]  ;;  %v1219_v26 = vld [vmem:[%s3930_s1 + $0x48] sm:$0xff]  ;;  %v1221_v28 = vld [vmem:[%s3930_s1 + $0x58] sm:$0xff]  ;;  %v2893_v34 = vpack.c.bf16 %v1456_v25, %v1440_v9 }
 0x44e   : > { %v1237_v31 = vld [vmem:[%s3930_s1 + $0xd8] sm:$0xff]  ;;  %v2861_v33 = vpack.c.bf16 %v1454_v6, %v1438_v23  ;;  %v1220_v37 = vld [vmem:[%s3930_s1 + $0x50] sm:$0xff]  ;;  %v1267_v41 = vld [vmem:[%s3930_s1 + $0x1c8] sm:$0xff] }
 0x44f   : > { %2842 = vmatpush1.bf16.msra.mxu0 %v2841_v30  ;;  %v2895_v30 = vpack.c.bf16 %v1235_v27, %v1219_v26  ;;  %v2927_v38 = vpack.c.bf16 %v1237_v31, %v1221_v28  ;;  %v1236_v39 = vld [vmem:[%s3930_s1 + $0xd0] sm:$0xff]  ;;  %v1253_v42 = vld [vmem:[%s3930_s1 + $0x158] sm:$0xff]  ;;  %v1299_v53 = vld [vmem:[%s3930_s1 + $0x2c8] sm:$0xff] }
 0x450   : > { %2874 = vmatpush1.bf16.msra.mxu1 %v2873_v35  ;;  %2844 = vmatprep.subr.bf16.mxu0 %v2843_v36  ;;  %v1218_v35 = vld [vmem:[%s3930_s1 + $0x40] sm:$0xff]  ;;  %v1269_v43 = vld [vmem:[%s3930_s1 + $0x1d8] sm:$0xff]  ;;  %v2929_v45 = vpack.c.bf16 %v1236_v39, %v1220_v37  ;;  %v1252_v49 = vld [vmem:[%s3930_s1 + $0x150] sm:$0xff] }
 0x451   : > { %2876 = vmatprep.subr.bf16.mxu1 %v2875_v40  ;;  %v1234_v36 = vld [vmem:[%s3930_s1 + $0xc0] sm:$0xff]  ;;  %v1251_v40 = vld [vmem:[%s3930_s1 + $0x148] sm:$0xff]  ;;  %v2931_v50 = vpack.c.bf16 %v1269_v43, %v1253_v42  ;;  %v1268_v51 = vld [vmem:[%s3930_s1 + $0x1d0] sm:$0xff] }
 0x452   : > { %v2897_v44 = vpack.c.bf16 %v1234_v36, %v1218_v35  ;;  %v1285_v54 = vld [vmem:[%s3930_s1 + $0x258] sm:$0xff]  ;;  %v2933_v57 = vpack.c.bf16 %v1268_v51, %v1252_v49  ;;  %v1284_v60 = vld [vmem:[%s3930_s1 + $0x250] sm:$0xff]  ;;  %v1331_v0 = vld [vmem:[%s3930_s1 + $0x3c8] sm:$0xff] }
 0x453   : > { %2846 = vmatpush1.bf16.msra.mxu0 %v2845_v46  ;;  %v2899_v46 = vpack.c.bf16 %v1267_v41, %v1251_v40  ;;  %v1301_v55 = vld [vmem:[%s3930_s1 + $0x2d8] sm:$0xff]  ;;  %v1300_v62 = vld [vmem:[%s3930_s1 + $0x2d0] sm:$0xff]  ;;  %v1363_v16 = vld [vmem:[%s3930_s1 + $0x4c8] sm:$0xff] }
 0x454   : > { %2878 = vmatpush1.bf16.msra.mxu1 %v2877_v47  ;;  %2848 = vmatprep.subr.bf16.mxu0 %v2847_v48  ;;  %v1250_v47 = vld [vmem:[%s3930_s1 + $0x140] sm:$0xff]  ;;  %v2935_v61 = vpack.c.bf16 %v1301_v55, %v1285_v54  ;;  %v1317_v1 = vld [vmem:[%s3930_s1 + $0x358] sm:$0xff]  ;;  %v2937_v8 = vpack.c.bf16 %v1300_v62, %v1284_v60  ;;  %v1316_v12 = vld [vmem:[%s3930_s1 + $0x350] sm:$0xff] }
 0x455   : > { %2880 = vmatprep.subr.bf16.mxu1 %v2879_v52  ;;  %v1266_v48 = vld [vmem:[%s3930_s1 + $0x1c0] sm:$0xff]  ;;  %v1283_v52 = vld [vmem:[%s3930_s1 + $0x248] sm:$0xff]  ;;  %v1333_v2 = vld [vmem:[%s3930_s1 + $0x3d8] sm:$0xff] }
 0x456   : > { %v2901_v56 = vpack.c.bf16 %v1266_v48, %v1250_v47  ;;  %v2939_v13 = vpack.c.bf16 %v1333_v2, %v1317_v1  ;;  %v1332_v14 = vld [vmem:[%s3930_s1 + $0x3d0] sm:$0xff]  ;;  %v1349_v17 = vld [vmem:[%s3930_s1 + $0x458] sm:$0xff]  ;;  %v1395_v25 = vld [vmem:[%s3930_s1 + $0x5c8] sm:$0xff] }
 0x457   : > { %2850 = vmatpush1.bf16.msra.mxu0 %v2849_v58  ;;  %v2903_v58 = vpack.c.bf16 %v1299_v53, %v1283_v52  ;;  %v1365_v18 = vld [vmem:[%s3930_s1 + $0x4d8] sm:$0xff]  ;;  %v2941_v20 = vpack.c.bf16 %v1332_v14, %v1316_v12  ;;  %v1348_v23 = vld [vmem:[%s3930_s1 + $0x450] sm:$0xff]  ;;  %v1427_v39 = vld [vmem:[%s3930_s1 + $0x6c8] sm:$0xff] }
 0x458   : > { %2882 = vmatpush1.bf16.msra.mxu1 %v2881_v59  ;;  %2852 = vmatprep.subr.bf16.mxu0 %v2851_v29  ;;  %v1282_v59 = vld [vmem:[%s3930_s1 + $0x240] sm:$0xff]  ;;  %v2943_v6 = vpack.c.bf16 %v1365_v18, %v1349_v17  ;;  %v1364_v9 = vld [vmem:[%s3930_s1 + $0x4d0] sm:$0xff]  ;;  %v1381_v26 = vld [vmem:[%s3930_s1 + $0x558] sm:$0xff] }
 0x459   : > { %2884 = vmatprep.subr.bf16.mxu1 %v2883_v63  ;;  %v1298_v29 = vld [vmem:[%s3930_s1 + $0x2c0] sm:$0xff]  ;;  %v1315_v63 = vld [vmem:[%s3930_s1 + $0x348] sm:$0xff]  ;;  %v1397_v27 = vld [vmem:[%s3930_s1 + $0x5d8] sm:$0xff]  ;;  %v2945_v31 = vpack.c.bf16 %v1364_v9, %v1348_v23 }
 0x45a   : > { %v2905_v3 = vpack.c.bf16 %v1298_v29, %v1282_v59  ;;  %v1380_v35 = vld [vmem:[%s3930_s1 + $0x550] sm:$0xff]  ;;  %v2947_v36 = vpack.c.bf16 %v1397_v27, %v1381_v26  ;;  %v1413_v40 = vld [vmem:[%s3930_s1 + $0x658] sm:$0xff]  ;;  %v1459_v51 = vld [vmem:[%s3930_s1 + $0x7c8] sm:$0xff] }
 0x45b   : > { %2854 = vmatpush1.bf16.msra.mxu0 %v2853_v4  ;;  %v2907_v4 = vpack.c.bf16 %v1331_v0, %v1315_v63  ;;  %v1396_v37 = vld [vmem:[%s3930_s1 + $0x5d0] sm:$0xff]  ;;  %v1429_v41 = vld [vmem:[%s3930_s1 + $0x6d8] sm:$0xff]  ;;  %v1239_v62 = vld [vmem:[%s3930_s1 + $0xe8] sm:$0xff] }
 0x45c   : > { %2886 = vmatpush1.bf16.msra.mxu1 %v2885_v5  ;;  %2856 = vmatprep.subr.bf16.mxu0 %v2855_v11  ;;  %v1314_v5 = vld [vmem:[%s3930_s1 + $0x340] sm:$0xff]  ;;  %v2949_v43 = vpack.c.bf16 %v1396_v37, %v1380_v35  ;;  %v1412_v47 = vld [vmem:[%s3930_s1 + $0x650] sm:$0xff]  ;;  %v2951_v48 = vpack.c.bf16 %v1429_v41, %v1413_v40  ;;  %v1445_v52 = vld [vmem:[%s3930_s1 + $0x758] sm:$0xff] }
 0x45d   : > { %2888 = vmatprep.subr.bf16.mxu1 %v2887_v15  ;;  %v1330_v11 = vld [vmem:[%s3930_s1 + $0x3c0] sm:$0xff]  ;;  %v1347_v15 = vld [vmem:[%s3930_s1 + $0x448] sm:$0xff]  ;;  %v1428_v49 = vld [vmem:[%s3930_s1 + $0x6d0] sm:$0xff] }
 0x45e   : > { %v2909_v19 = vpack.c.bf16 %v1330_v11, %v1314_v5  ;;  %v1461_v53 = vld [vmem:[%s3930_s1 + $0x7d8] sm:$0xff]  ;;  %v2953_v55 = vpack.c.bf16 %v1428_v49, %v1412_v47  ;;  %v1444_v59 = vld [vmem:[%s3930_s1 + $0x750] sm:$0xff]  ;;  %v1271_v14 = vld [vmem:[%s3930_s1 + $0x1e8] sm:$0xff] }
 0x45f   : > { %2858 = vmatpush1.bf16.msra.mxu0 %v2857_v21  ;;  %v2911_v21 = vpack.c.bf16 %v1363_v16, %v1347_v15  ;;  %v2955_v29 = vpack.c.bf16 %v1461_v53, %v1445_v52  ;;  %v1460_v60 = vld [vmem:[%s3930_s1 + $0x7d0] sm:$0xff]  ;;  %v1225_v63 = vld [vmem:[%s3930_s1 + $0x78] sm:$0xff]  ;;  %v1303_v9 = vld [vmem:[%s3930_s1 + $0x2e8] sm:$0xff] }
 0x460   : > { %2890 = vmatpush1.bf16.msra.mxu1 %v2889_v22  ;;  %2860 = vmatprep.subr.bf16.mxu0 %v2859_v7  ;;  %v1346_v22 = vld [vmem:[%s3930_s1 + $0x440] sm:$0xff]  ;;  %v1241_v0 = vld [vmem:[%s3930_s1 + $0xf8] sm:$0xff]  ;;  %v2957_v2 = vpack.c.bf16 %v1460_v60, %v1444_v59  ;;  %v1224_v5 = vld [vmem:[%s3930_s1 + $0x70] sm:$0xff] }
 0x461   : > { %2892 = vmatprep.subr.bf16.mxu1 %v2891_v24  ;;  %v1362_v7 = vld [vmem:[%s3930_s1 + $0x4c0] sm:$0xff]  ;;  %v1379_v24 = vld [vmem:[%s3930_s1 + $0x548] sm:$0xff]  ;;  %v2991_v11 = vpack.c.bf16 %v1241_v0, %v1225_v63  ;;  %v1240_v12 = vld [vmem:[%s3930_s1 + $0xf0] sm:$0xff] }
 0x462   : > { %v2913_v28 = vpack.c.bf16 %v1362_v7, %v1346_v22  ;;  %v1257_v15 = vld [vmem:[%s3930_s1 + $0x178] sm:$0xff]  ;;  %v2993_v18 = vpack.c.bf16 %v1240_v12, %v1224_v5  ;;  %v1256_v22 = vld [vmem:[%s3930_s1 + $0x170] sm:$0xff]  ;;  %v1335_v37 = vld [vmem:[%s3930_s1 + $0x3e8] sm:$0xff] }
 0x463   : > { %2862 = vmatpush1.bf16.msra.mxu0 %v2861_v33  ;;  %v2915_v33 = vpack.c.bf16 %v1395_v25, %v1379_v24  ;;  %v1273_v16 = vld [vmem:[%s3930_s1 + $0x1f8] sm:$0xff]  ;;  %v1272_v23 = vld [vmem:[%s3930_s1 + $0x1f0] sm:$0xff]  ;;  %v1383_v59 = vld [vmem:[%s3930_s1 + $0x568] sm:$0xff] }
 0x464   : > { %2894 = vmatpush1.bf16.msra.mxu1 %v2893_v34  ;;  %2896 = vmatprep.subr.bf16.mxu0 %v2895_v30  ;;  %v1378_v34 = vld [vmem:[%s3930_s1 + $0x540] sm:$0xff]  ;;  %v2995_v7 = vpack.c.bf16 %v1273_v16, %v1257_v15  ;;  %v1289_v24 = vld [vmem:[%s3930_s1 + $0x278] sm:$0xff]  ;;  %v2997_v27 = vpack.c.bf16 %v1272_v23, %v1256_v22  ;;  %v1304_v35 = vld [vmem:[%s3930_s1 + $0x2f0] sm:$0xff] }
 0x465   : > { %2928 = vmatprep.subr.bf16.mxu1 %v2927_v38  ;;  %v1394_v30 = vld [vmem:[%s3930_s1 + $0x5c0] sm:$0xff]  ;;  %v1411_v38 = vld [vmem:[%s3930_s1 + $0x648] sm:$0xff]  ;;  %v1305_v25 = vld [vmem:[%s3930_s1 + $0x2f8] sm:$0xff] }
 0x466   : > { %1757 = vmatmul.mubr.f32.vlgmr.msra.gmra.mrb[2].mxu0 %v4054_v10  ;;  %v2917_v42 = vpack.c.bf16 %v1394_v30, %v1378_v34  ;;  %v1288_v34 = vld [vmem:[%s3930_s1 + $0x270] sm:$0xff]  ;;  %v2999_v30 = vpack.c.bf16 %v1305_v25, %v1289_v24  ;;  %v1353_v49 = vld [vmem:[%s3930_s1 + $0x478] sm:$0xff]  ;;  %v1415_v5 = vld [vmem:[%s3930_s1 + $0x668] sm:$0xff] }
 0x467   : > { %1828 = vmatmul.mubr.f32.vlgmr.msra.gmra.mrb[2].mxu1 %v4054_v10  ;;  %2898 = vmatpush1.bf16.msra.mxu0 %v2897_v44  ;;  %v2919_v44 = vpack.c.bf16 %v1427_v39, %v1411_v38  ;;  %v1321_v38 = vld [vmem:[%s3930_s1 + $0x378] sm:$0xff]  ;;  %v3001_v41 = vpack.c.bf16 %v1304_v35, %v1288_v34  ;;  %v1336_v47 = vld [vmem:[%s3930_s1 + $0x3f0] sm:$0xff]  ;;  %v1447_v22 = vld [vmem:[%s3930_s1 + $0x768] sm:$0xff]  ;;  %v1470_v35 = vlaneseq }
 0x468   : > { %2930 = vmatpush1.bf16.msra.mxu1 %v2929_v45  ;;  %2900 = vmatprep.subr.bf16.mxu0 %v2899_v46  ;;  %v1410_v45 = vld [vmem:[%s3930_s1 + $0x640] sm:$0xff]  ;;  %v1337_v39 = vld [vmem:[%s3930_s1 + $0x3f8] sm:$0xff] }
 0x469   : > { %2932 = vmatprep.subr.bf16.mxu1 %v2931_v50  ;;  %1898 = vmatprep.mubr.f32.mxu0 %v3550_v32  ;;  %v1426_v46 = vld [vmem:[%s3930_s1 + $0x6c0] sm:$0xff]  ;;  %v1443_v50 = vld [vmem:[%s3930_s1 + $0x748] sm:$0xff]  ;;  %v1385_v60 = vld [vmem:[%s3930_s1 + $0x578] sm:$0xff] }
 0x46a   : > { %1969 = vmatprep.mubr.f32.mxu1 %v3550_v32  ;;  %v2921_v54 = vpack.c.bf16 %v1426_v46, %v1410_v45  ;;  %v1320_v45 = vld [vmem:[%s3930_s1 + $0x370] sm:$0xff]  ;;  %v3003_v46 = vpack.c.bf16 %v1337_v39, %v1321_v38  ;;  %v1417_v12 = vld [vmem:[%s3930_s1 + $0x678] sm:$0xff] }
 0x46b   : > { %2902 = vmatpush1.bf16.msra.mxu0 %v2901_v56  ;;  %v2923_v56 = vpack.c.bf16 %v1459_v51, %v1443_v50  ;;  %v1369_v50 = vld [vmem:[%s3930_s1 + $0x4f8] sm:$0xff]  ;;  %v3005_v52 = vpack.c.bf16 %v1336_v47, %v1320_v45  ;;  %v1466_v38 = vld [vmem:[%s487_s27] sm:$0xff] }
 0x46c   : > { %2934 = vmatpush1.bf16.msra.mxu1 %v2933_v57  ;;  %2904 = vmatprep.subr.bf16.mxu0 %v2903_v58  ;;  %v1442_v57 = vld [vmem:[%s3930_s1 + $0x740] sm:$0xff]  ;;  %v1449_v23 = vld [vmem:[%s3930_s1 + $0x778] sm:$0xff] }
 0x46d   : > { %2936 = vmatprep.subr.bf16.mxu1 %v2935_v61  ;;  %v1458_v58 = vld [vmem:[%s3930_s1 + $0x7c0] sm:$0xff]  ;;  %v1223_v61 = vld [vmem:[%s3930_s1 + $0x68] sm:$0xff] }
 0x46e   : > { %v2925_v1 = vpack.c.bf16 %v1458_v58, %v1442_v57  ;;  %v3007_v57 = vpack.c.bf16 %v1369_v50, %v1353_v49  ;;  %v1368_v58 = vld [vmem:[%s3930_s1 + $0x4f0] sm:$0xff] }
 0x46f   : > { %2906 = vmatpush1.bf16.msra.mxu0 %v2905_v3  ;;  %v2959_v3 = vpack.c.bf16 %v1239_v62, %v1223_v61  ;;  %v1401_v61 = vld [vmem:[%s3930_s1 + $0x5f8] sm:$0xff] }
 0x470   : > { %2938 = vmatpush1.bf16.msra.mxu1 %v2937_v8  ;;  %2908 = vmatprep.subr.bf16.mxu0 %v2907_v4  ;;  %v1222_v8 = vld [vmem:[%s3930_s1 + $0x60] sm:$0xff] }
 0x471   : > { %2940 = vmatprep.subr.bf16.mxu1 %v2939_v13  ;;  %v1238_v4 = vld [vmem:[%s3930_s1 + $0xe0] sm:$0xff]  ;;  %v1255_v13 = vld [vmem:[%s3930_s1 + $0x168] sm:$0xff] }
 0x472   : > { %v2961_v17 = vpack.c.bf16 %v1238_v4, %v1222_v8  ;;  %v3011_v8 = vpack.c.bf16 %v1401_v61, %v1385_v60  ;;  %v1400_v4 = vld [vmem:[%s3930_s1 + $0x5f0] sm:$0xff] }
 0x473   : > { %2910 = vmatpush1.bf16.msra.mxu0 %v2909_v19  ;;  %v2963_v19 = vpack.c.bf16 %v1271_v14, %v1255_v13  ;;  %v1433_v13 = vld [vmem:[%s3930_s1 + $0x6f8] sm:$0xff] }
 0x474   : > { %2942 = vmatpush1.bf16.msra.mxu1 %v2941_v20  ;;  %2912 = vmatprep.subr.bf16.mxu0 %v2911_v21  ;;  %v1254_v20 = vld [vmem:[%s3930_s1 + $0x160] sm:$0xff] }
 0x475   : > { %2944 = vmatprep.subr.bf16.mxu1 %v2943_v6  ;;  %v1270_v21 = vld [vmem:[%s3930_s1 + $0x1e0] sm:$0xff]  ;;  %v1287_v6 = vld [vmem:[%s3930_s1 + $0x268] sm:$0xff] }
 0x476   : > { %v2965_v26 = vpack.c.bf16 %v1270_v21, %v1254_v20  ;;  %v3015_v20 = vpack.c.bf16 %v1433_v13, %v1417_v12  ;;  %v1432_v21 = vld [vmem:[%s3930_s1 + $0x6f0] sm:$0xff] }
 0x477   : > { %2914 = vmatpush1.bf16.msra.mxu0 %v2913_v28  ;;  %v2967_v28 = vpack.c.bf16 %v1303_v9, %v1287_v6  ;;  %v1465_v6 = vld [vmem:[%s3930_s1 + $0x7f8] sm:$0xff] }
 0x478   : > { %2946 = vmatpush1.bf16.msra.mxu1 %v2945_v31  ;;  %2916 = vmatprep.subr.bf16.mxu0 %v2915_v33  ;;  %v1286_v31 = vld [vmem:[%s3930_s1 + $0x260] sm:$0xff] }
 0x479   : > { %2948 = vmatprep.subr.bf16.mxu1 %v2947_v36  ;;  %v1302_v33 = vld [vmem:[%s3930_s1 + $0x2e0] sm:$0xff]  ;;  %v1319_v36 = vld [vmem:[%s3930_s1 + $0x368] sm:$0xff] }
 0x47a   : > { %v2969_v40 = vpack.c.bf16 %v1302_v33, %v1286_v31  ;;  %v1448_v31 = vld [vmem:[%s3930_s1 + $0x770] sm:$0xff] }
 0x47b   : > { %2918 = vmatpush1.bf16.msra.mxu0 %v2917_v42  ;;  %v2971_v42 = vpack.c.bf16 %v1335_v37, %v1319_v36  ;;  %v1464_v33 = vld [vmem:[%s3930_s1 + $0x7f0] sm:$0xff]  ;;  %v4250_v36 = vshrl.u32 %v1470_v35, 7 }
 0x47c   : > { %2950 = vmatpush1.bf16.msra.mxu1 %v2949_v43  ;;  %2920 = vmatprep.subr.bf16.mxu0 %v2919_v44  ;;  %v1318_v43 = vld [vmem:[%s3930_s1 + $0x360] sm:$0xff] }
 0x47d   : > { %2952 = vmatprep.subr.bf16.mxu1 %v2951_v48  ;;  %v1334_v44 = vld [vmem:[%s3930_s1 + $0x3e0] sm:$0xff]  ;;  %v1351_v48 = vld [vmem:[%s3930_s1 + $0x468] sm:$0xff]  ;;  %v1472_v37 = vsub.s32 0, %v4250_v36  ;;  %v1480_v39 = vsub.s32 2, %v4250_v36 }
 0x47e   : > { %v2973_v51 = vpack.c.bf16 %v1334_v44, %v1318_v43 }
 0x47f   : > { %2922 = vmatpush1.bf16.msra.mxu0 %v2921_v54  ;;  %v1350_v54 = vld [vmem:[%s3930_s1 + $0x460] sm:$0xff]  ;;  %v1481_v43 = vrot.slane %v1466_v38, %v1480_v39 }
 0x480   : > { %2954 = vmatpush1.bf16.msra.mxu1 %v2953_v55  ;;  %2924 = vmatprep.subr.bf16.mxu0 %v2923_v56  ;;  %v1366_v55 = vld [vmem:[%s3930_s1 + $0x4e0] sm:$0xff]  ;;  %v1352_v56 = vld [vmem:[%s3930_s1 + $0x470] sm:$0xff] }
 0x481   : > { %2956 = vmatprep.subr.bf16.mxu1 %v2955_v29  ;;  %v1399_v29 = vld [vmem:[%s3930_s1 + $0x5e8] sm:$0xff]  ;;  %v2977_v62 = vpack.c.bf16 %v1366_v55, %v1350_v54  ;;  %v3009_v63 = vpack.c.bf16 %v1368_v58, %v1352_v56  ;;  %v1492_v54 = vsub.s32 5, %v4250_v36  ;;  %v1500_v55 = vsub.s32 7, %v4250_v36 }
 0x482   : > { %v2979_v0 = vpack.c.bf16 %v1399_v29, %v1383_v59 }
 0x483   : > { %2926 = vmatpush1.bf16.msra.mxu0 %v2925_v1  ;;  %v1382_v1 = vld [vmem:[%s3930_s1 + $0x560] sm:$0xff]  ;;  %v1493_v58 = vrot.slane %v1466_v38, %v1492_v54  ;;  %v1501_v59 = vrot.slane %v1466_v38, %v1500_v55 }
 0x484   : > { %2958 = vmatpush1.bf16.msra.mxu1 %v2957_v2  ;;  %2960 = vmatprep.subr.bf16.mxu0 %v2959_v3  ;;  %v1398_v2 = vld [vmem:[%s3930_s1 + $0x5e0] sm:$0xff]  ;;  %v1384_v3 = vld [vmem:[%s3930_s1 + $0x570] sm:$0xff] }
 0x485   : > { %2992 = vmatprep.subr.bf16.mxu1 %v2991_v11  ;;  %v1431_v11 = vld [vmem:[%s3930_s1 + $0x6e8] sm:$0xff]  ;;  %v2981_v14 = vpack.c.bf16 %v1398_v2, %v1382_v1  ;;  %v3013_v15 = vpack.c.bf16 %v1400_v4, %v1384_v3 }
 0x486   : > { %1899 = vmatmul.mubr.f32.vlgmr.msra.gmra.mrb[4].mxu0 %v4054_v10  ;;  %v2983_v16 = vpack.c.bf16 %v1431_v11, %v1415_v5  ;;  %v1467_v3 = vld [vmem:[%s487_s27 + $0x8] sm:$0xff] }
 0x487   : > { %1970 = vmatmul.mubr.f32.vlgmr.msra.gmra.mrb[4].mxu1 %v4054_v10  ;;  %2962 = vmatpush1.bf16.msra.mxu0 %v2961_v17  ;;  %v1414_v17 = vld [vmem:[%s3930_s1 + $0x660] sm:$0xff]  ;;  %v1513_v4 = vrot.slane %v1467_v3, %v1480_v39 }
 0x488   : > { %2994 = vmatpush1.bf16.msra.mxu1 %v2993_v18  ;;  %2964 = vmatprep.subr.bf16.mxu0 %v2963_v19  ;;  %v1430_v18 = vld [vmem:[%s3930_s1 + $0x6e0] sm:$0xff]  ;;  %v1416_v19 = vld [vmem:[%s3930_s1 + $0x670] sm:$0xff] }
 0x489   : > { %2996 = vmatprep.subr.bf16.mxu1 %v2995_v7  ;;  %2040 = vmatprep.mubr.f32.mxu0 %v3550_v32  ;;  %v1463_v7 = vld [vmem:[%s3930_s1 + $0x7e8] sm:$0xff]  ;;  %v2985_v9 = vpack.c.bf16 %v1430_v18, %v1414_v17  ;;  %v3017_v24 = vpack.c.bf16 %v1432_v21, %v1416_v19 }
 0x48a   : > { %2111 = vmatprep.mubr.f32.mxu1 %v3550_v32  ;;  %v1367_v32 = vld [vmem:[%s3930_s1 + $0x4e8] sm:$0xff]  ;;  %v2987_v25 = vpack.c.bf16 %v1463_v7, %v1447_v22  ;;  %v1525_v22 = vrot.slane %v1467_v3, %v1492_v54 }
 0x48b   : > { %2966 = vmatpush1.bf16.msra.mxu0 %v2965_v26  ;;  %v2975_v53 = vpack.c.bf16 %v1367_v32, %v1351_v48  ;;  %v1446_v26 = vld [vmem:[%s3930_s1 + $0x760] sm:$0xff] }
 0x48c   : > { %2998 = vmatpush1.bf16.msra.mxu1 %v2997_v27  ;;  %2968 = vmatprep.subr.bf16.mxu0 %v2967_v28  ;;  %v1462_v27 = vld [vmem:[%s3930_s1 + $0x7e0] sm:$0xff]  ;;  %v3019_v28 = vpack.c.bf16 %v1465_v6, %v1449_v23  ;;  %v1533_v23 = vrot.slane %v1467_v3, %v1500_v55 }
 0x48d   : > { %3000 = vmatprep.subr.bf16.mxu1 %v2999_v30  ;;  %v2989_v34 = vpack.c.bf16 %v1462_v27, %v1446_v26  ;;  %v3021_v30 = vpack.c.bf16 %v1464_v33, %v1448_v31 }
 0x48f   : > { %2970 = vmatpush1.bf16.msra.mxu0 %v2969_v40  ;;  %v1476_v40 = vsub.s32 1, %v4250_v36 }
 0x490   : > { %3002 = vmatpush1.bf16.msra.mxu1 %v3001_v41  ;;  %2972 = vmatprep.subr.bf16.mxu0 %v2971_v42  ;;  %v1484_v41 = vsub.s32 3, %v4250_v36  ;;  %v1473_v42 = vrot.slane %v1466_v38, %v1472_v37 }
 0x491   : > { %3004 = vmatprep.subr.bf16.mxu1 %v3003_v46  ;;  %v1509_v5 = vrot.slane %v1467_v3, %v1476_v40 }
 0x492   : > { %v1485_v44 = vrot.slane %v1466_v38, %v1484_v41  ;;  %v1517_v11 = vrot.slane %v1467_v3, %v1484_v41 }
 0x493   : > { %2974 = vmatpush1.bf16.msra.mxu0 %v2973_v51 }
 0x494   : > { %3006 = vmatpush1.bf16.msra.mxu1 %v3005_v52  ;;  %2976 = vmatprep.subr.bf16.mxu0 %v2975_v53  ;;  %v1488_v52 = vsub.s32 4, %v4250_v36  ;;  %v1496_v53 = vsub.s32 6, %v4250_v36 }
 0x495   : > { %3008 = vmatprep.subr.bf16.mxu1 %v3007_v57 }
 0x496   : > { %v1489_v56 = vrot.slane %v1466_v38, %v1488_v52  ;;  %v1497_v57 = vrot.slane %v1466_v38, %v1496_v53  ;;  %v1529_v21 = vrot.slane %v1467_v3, %v1496_v53 }
 0x497   : > { %2978 = vmatpush1.bf16.msra.mxu0 %v2977_v62 }
 0x498   : > { %3010 = vmatpush1.bf16.msra.mxu1 %v3009_v63  ;;  %2980 = vmatprep.subr.bf16.mxu0 %v2979_v0 }
 0x499   : > { %3012 = vmatprep.subr.bf16.mxu1 %v3011_v8  ;;  %v1505_v8 = vrot.slane %v1467_v3, %v1472_v37 }
 0x49b   : > { %2982 = vmatpush1.bf16.msra.mxu0 %v2981_v14 }
 0x49c   : > { %3014 = vmatpush1.bf16.msra.mxu1 %v3013_v15  ;;  %2984 = vmatprep.subr.bf16.mxu0 %v2983_v16 }
 0x49d   : > { %3016 = vmatprep.subr.bf16.mxu1 %v3015_v20  ;;  %v1521_v20 = vrot.slane %v1467_v3, %v1488_v52 }
 0x49f   : > { %2986 = vmatpush1.bf16.msra.mxu0 %v2985_v9 }
 0x4a0   : > { %3018 = vmatpush1.bf16.msra.mxu1 %v3017_v24  ;;  %2988 = vmatprep.subr.bf16.mxu0 %v2987_v25 }
 0x4a1   : > { %3020 = vmatprep.subr.bf16.mxu1 %v3019_v28 }
 0x4a3   : > { %2990 = vmatpush1.bf16.msra.mxu0 %v2989_v34 }
 0x4a4   : > { %3022 = vmatpush1.bf16.msra.mxu1 %v3021_v30 }
 0x4a6   : > { %2041 = vmatmul.mubr.f32.vlgmr.msra.gmra.mrb[6].mxu0 %v4054_v10 }
 0x4a7   : > { %2112 = vmatmul.mubr.f32.vlgmr.msra.gmra.mrb[6].mxu1 %v4054_v10  ;;  %v1477_v10 = vrot.slane %v1466_v38, %v1476_v40 }
 0x519   : > { %v1616_v45 = vpop.f32.mrb[0].mxu0 }
 0x51a   : > { %v4258_v46 = vadd.f32 %v1616_v45, %v1473_v42  ;;  %v1687_v47 = vpop.f32.mrb[0].mxu1  ;;  %v1618_v48 = vpop.f32.mrb[1].mxu0  ;;  %v3551_v45 = vmov 0  }
 0x51b   : > { %v4260_v32 = vadd.f32 %v1687_v47, %v1481_v43  ;;  %v4262_v49 = vadd.f32 %v1618_v48, %v1477_v10  ;;  %v1689_v50 = vpop.f32.mrb[1].mxu1  ;;  %3170 = vset.pattern.permute.xlu0 %v3551_v45  ;;  %v4344_v47 = vld [vmem:[#allocation3] sm:$0xff] }
 0x51c   : > { %2118 = vst [vmem:[%s3942_s23] sm:$0xff] %v4258_v46  ;;  %v4266_v51 = vadd.f32 %v1689_v50, %v1485_v44 }
 0x51d   : > { %2120 = vst [vmem:[%s3942_s23 + $0x10] sm:$0xff] %v4260_v32  ;;  %2119 = vst [vmem:[%s3942_s23 + $0x8] sm:$0xff] %v4262_v49 }
 0x51e   : > { %2121 = vst [vmem:[%s3942_s23 + $0x18] sm:$0xff] %v4266_v51 }
 0x539   : > { %v1758_v29 = vpop.f32.mrb[2].mxu0 }
 0x53a   : > { %v4278_v60 = vadd.f32 %v1758_v29, %v1489_v56  ;;  %v1829_v61 = vpop.f32.mrb[2].mxu1  ;;  %v1760_v62 = vpop.f32.mrb[3].mxu0 }
 0x53b   : > { %v4280_v63 = vadd.f32 %v1829_v61, %v1497_v57  ;;  %v4282_v0 = vadd.f32 %v1760_v62, %v1493_v58  ;;  %v1831_v1 = vpop.f32.mrb[3].mxu1 }
 0x53c   : > { %2122 = vst [vmem:[%s3942_s23 + $0x20] sm:$0xff] %v4278_v60  ;;  %v4286_v2 = vadd.f32 %v1831_v1, %v1501_v59  ;;  %v2135_v7 = vmax.f32 %v4258_v46, %v4278_v60 }
 0x53d   : > { %2124 = vst [vmem:[%s3942_s23 + $0x30] sm:$0xff] %v4280_v63  ;;  %2123 = vst [vmem:[%s3942_s23 + $0x28] sm:$0xff] %v4282_v0  ;;  %v2137_v6 = vmax.f32 %v4260_v32, %v4280_v63  ;;  %v2136_v9 = vmax.f32 %v4262_v49, %v4282_v0 }
 0x53e   : > { %2125 = vst [vmem:[%s3942_s23 + $0x38] sm:$0xff] %v4286_v2  ;;  %v2138_v25 = vmax.f32 %v4266_v51, %v4286_v2 }
 0x559   : > { %v1900_v12 = vpop.f32.mrb[4].mxu0 }
 0x55a   : > { %v4296_v13 = vadd.f32 %v1900_v12, %v1505_v8  ;;  %v1971_v14 = vpop.f32.mrb[4].mxu1  ;;  %v1902_v15 = vpop.f32.mrb[5].mxu0 }
 0x55b   : > { %v4298_v16 = vadd.f32 %v1971_v14, %v1513_v4  ;;  %v4300_v17 = vadd.f32 %v1902_v15, %v1509_v5  ;;  %v1973_v18 = vpop.f32.mrb[5].mxu1 }
 0x55c   : > { %2126 = vst [vmem:[%s3942_s23 + $0x40] sm:$0xff] %v4296_v13  ;;  %v4304_v19 = vadd.f32 %v1973_v18, %v1517_v11  ;;  %v2139_v26 = vmax.f32 %v2135_v7, %v4296_v13 }
 0x55d   : > { %2128 = vst [vmem:[%s3942_s23 + $0x50] sm:$0xff] %v4298_v16  ;;  %2127 = vst [vmem:[%s3942_s23 + $0x48] sm:$0xff] %v4300_v17  ;;  %v2141_v33 = vmax.f32 %v2137_v6, %v4298_v16  ;;  %v2140_v34 = vmax.f32 %v2136_v9, %v4300_v17 }
 0x55e   : > { %2129 = vst [vmem:[%s3942_s23 + $0x58] sm:$0xff] %v4304_v19  ;;  %v2142_v37 = vmax.f32 %v2138_v25, %v4304_v19 }
 0x579   : > { %v2042_v24 = vpop.f32.mrb[6].mxu0 }
 0x57a   : > { %v4321_v27 = vadd.f32 %v2042_v24, %v1521_v20  ;;  %v2113_v28 = vpop.f32.mrb[6].mxu1  ;;  %v2044_v31 = vpop.f32.mrb[7].mxu0 }
 0x57b   : > { %v4325_v30 = vadd.f32 %v2113_v28, %v1529_v21  ;;  %v4327_v35 = vadd.f32 %v2044_v31, %v1525_v22  ;;  %v2115_v36 = vpop.f32.mrb[7].mxu1 }
 0x57c   : > { %2130 = vst [vmem:[%s3942_s23 + $0x60] sm:$0xff] %v4321_v27  ;;  %v4332_v38 = vadd.f32 %v2115_v36, %v1533_v23  ;;  %v2143_v39 = vmax.f32 %v2139_v26, %v4321_v27 }
 0x57d   : > { %2132 = vst [vmem:[%s3942_s23 + $0x70] sm:$0xff] %v4325_v30  ;;  %2131 = vst [vmem:[%s3942_s23 + $0x68] sm:$0xff] %v4327_v35  ;;  %v2144_v40 = vmax.f32 %v2140_v34, %v4327_v35  ;;  %v2145_v41 = vmax.f32 %v2141_v33, %v4325_v30 }
 0x57e   : > { %2133 = vst [vmem:[%s3942_s23 + $0x78] sm:$0xff] %v4332_v38  ;;  %v2146_v42 = vmax.f32 %v2142_v37, %v4332_v38 }
 0x57f   : > { %v2147_v43 = vmax.f32 %v2143_v39, %v2144_v40 }
 0x580   : > { %v2148_v10 = vmax.f32 %v2145_v41, %v2146_v42 }
 0x582   : > { %v2149_v44 = vmax.f32 %v2147_v43, %v2148_v10 }
 0x584   : > { %2150 = vmax.xlane.f32.xlu0 %v2149_v44 }
 0x611   : > { %v2151_v48 = vpop.xlane.xlu0 %2150 }
 0x612   : > { %v4347_v50 = vmax.f32 %v4344_v47, %v2151_v48 }
 0x614   : > { %v2153_v52 = vsub.f32 %v4344_v47, %v4347_v50  ;;  %2231 = vst.msk [vmem:[#allocation3] sm:$0xff] %vm2229_vm2, %v4347_v50  ;;  %2160 = vperm.xlu0 %3170, %v4347_v50  }
 0x693   : > { %v2161_v53 = vpop.permute.xlu0 %2160 }
 0x694   : > { %v2163_v54 = vsub.f32 %v4258_v46, %v2161_v53  ;;  %v2164_v55 = vsub.f32 %v4262_v49, %v2161_v53  ;;  %v2165_v56 = vsub.f32 %v4260_v32, %v2161_v53  ;;  %v2166_v57 = vsub.f32 %v4266_v51, %v2161_v53 }
 0x695   : > { %v2167_v29 = vsub.f32 %v4278_v60, %v2161_v53  ;;  %v2168_v62 = vsub.f32 %v4282_v0, %v2161_v53  ;;  %v2169_v3 = vsub.f32 %v4280_v63, %v2161_v53  ;;  %v2170_v49 = vsub.f32 %v4286_v2, %v2161_v53 }
 0x696   : > { %v2179_v58 = vmul.f32 1.442695, %v2163_v54  ;;  %v2181_v59 = vmul.f32 1.442695, %v2164_v55  ;;  %v2183_v61 = vmul.f32 1.442695, %v2165_v56  ;;  %v2171_v51 = vsub.f32 %v4296_v13, %v2161_v53 }
 0x697   : > { %v2185_v1 = vmul.f32 1.442695, %v2166_v57  ;;  %v2187_v46 = vmul.f32 1.442695, %v2167_v29  ;;  %v2189_v32 = vmul.f32 1.442695, %v2168_v62  ;;  %v2172_v60 = vsub.f32 %v4300_v17, %v2161_v53 }
 0x698   : > { %3171 = vpow2.f32 %v2179_v58  ;;  %v2191_v8 = vmul.f32 1.442695, %v2169_v3  ;;  %v2193_v4 = vmul.f32 1.442695, %v2170_v49  ;;  %v2173_v11 = vsub.f32 %v4298_v16, %v2161_v53  ;;  %v2156_v58 = vld [vmem:[#allocation4] sm:$0xff]  ;;  %v2236_v3 = vld [vmem:[#allocation3] sm:$0xff] (!%p2486_p1) }
 0x699   : > { %3173 = vpow2.f32 %v2181_v59  ;;  %v2195_v63 = vmul.f32 1.442695, %v2171_v51  ;;  %v2174_v2 = vsub.f32 %v4304_v19, %v2161_v53  ;;  %v2197_v15 = vmul.f32 1.442695, %v2172_v60 }
 0x69a   : > { %3175 = vpow2.f32 %v2183_v61  ;;  %v2175_v20 = vsub.f32 %v4321_v27, %v2161_v53  ;;  %v2199_v17 = vmul.f32 1.442695, %v2173_v11  ;;  %v2176_v7 = vsub.f32 %v4327_v35, %v2161_v53 }
 0x69b   : > { %3177 = vpow2.f32 %v2185_v1  ;;  %v2201_v16 = vmul.f32 1.442695, %v2174_v2  ;;  %v2177_v9 = vsub.f32 %v4325_v30, %v2161_v53  ;;  %v2178_v26 = vsub.f32 %v4332_v38, %v2161_v53 }
 0x69c   : > { %3179 = vpow2.f32 %v2187_v46  ;;  %v2203_v19 = vmul.f32 1.442695, %v2175_v20  ;;  %v2205_v27 = vmul.f32 1.442695, %v2176_v7  ;;  %v2154_v56 = vmul.f32 1.442695, %v2153_v52 }
 0x69d   : > { %3181 = vpow2.f32 %v2189_v32  ;;  %v2207_v33 = vmul.f32 1.442695, %v2177_v9  ;;  %v2209_v36 = vmul.f32 1.442695, %v2178_v26 }
 0x69e   : > { %3183 = vpow2.f32 %v2191_v8 }
 0x69f   : > { %3185 = vpow2.f32 %v2193_v4 }
 0x6a0   : > { %3187 = vpow2.f32 %v2195_v63 }
 0x6a1   : > { %3189 = vpow2.f32 %v2197_v15 }
 0x6a2   : > { %v3172_v5 = vpop.eup %3171  ;;  %3191 = vpow2.f32 %v2199_v17 }
 0x6a3   : > { %v3174_v0 = vpop.eup %3173  ;;  %3193 = vpow2.f32 %v2201_v16 }
 0x6a4   : > { %v2211_v12 = vadd.f32 %v3174_v0, %v3172_v5  ;;  %v3176_v14 = vpop.eup %3175  ;;  %3195 = vpow2.f32 %v2203_v19 }
 0x6a5   : > { %v3178_v13 = vpop.eup %3177  ;;  %3197 = vpow2.f32 %v2205_v27 }
 0x6a6   : > { %v2212_v18 = vadd.f32 %v3176_v14, %v2211_v12  ;;  %v3180_v22 = vpop.eup %3179  ;;  %3199 = vpow2.f32 %v2207_v33 }
 0x6a7   : > { %v3182_v6 = vpop.eup %3181  ;;  %3201 = vpow2.f32 %v2209_v36 }
 0x6a8   : > { %v2213_v21 = vadd.f32 %v3178_v13, %v2212_v18  ;;  %v3184_v25 = vpop.eup %3183  ;;  %3203 = vpow2.f32 %v2154_v56 }
 0x6a9   : > { %v3186_v31 = vpop.eup %3185 }
 0x6aa   : > { %v2214_v23 = vadd.f32 %v3180_v22, %v2213_v21  ;;  %v3188_v35 = vpop.eup %3187 }
 0x6ab   : > { %v3190_v39 = vpop.eup %3189 }
 0x6ac   : > { %v2215_v24 = vadd.f32 %v3182_v6, %v2214_v23  ;;  %v3192_v40 = vpop.eup %3191 }
 0x6ad   : > { %v3194_v42 = vpop.eup %3193 }
 0x6ae   : > { %v2216_v28 = vadd.f32 %v3184_v25, %v2215_v24  ;;  %v3196_v38 = vpop.eup %3195 }
 0x6af   : > { %v3198_v44 = vpop.eup %3197 }
 0x6b0   : > { %v2217_v34 = vadd.f32 %v3186_v31, %v2216_v28  ;;  %v3200_v48 = vpop.eup %3199 }
 0x6b1   : > { %v3202_v54 = vpop.eup %3201 }
 0x6b2   : > { %v2218_v37 = vadd.f32 %v3188_v35, %v2217_v34  ;;  %v3204_v57 = vpop.eup %3203 }
 0x6b3   : > { %v2157_v59 = vmul.f32 %v3204_v57, %v2156_v58 }
 0x6b4   : > { %v2219_v30 = vadd.f32 %v3190_v39, %v2218_v37 }
 0x6b6   : > { %v2220_v41 = vadd.f32 %v3192_v40, %v2219_v30 }
 0x6b8   : > { %v2221_v43 = vadd.f32 %v3194_v42, %v2220_v41 }
 0x6ba   : > { %v2222_v10 = vadd.f32 %v3196_v38, %v2221_v43 }
 0x6bc   : > { %v2223_v45 = vadd.f32 %v3198_v44, %v2222_v10 }
 0x6be   : > { %v2224_v53 = vadd.f32 %v3200_v48, %v2223_v45 }
 0x6c0   : > { %v2225_v55 = vadd.f32 %v3202_v54, %v2224_v53 }
 0x6c2   : > { %2226 = vadd.xlane.f32.xlu1 %v2225_v55 }
 0x74c   : > { %2235 = sbr.rel (%p2486_p1) target bundleno = 1898 (0x76a), region = 100 }
 0x74f   : > { %v2227_v29 = vpop.xlane.xlu1 %2226 }
 0x750   : > { %v2228_v61 = vadd.f32 %v2227_v29, %v2157_v59 }
 0x752   : > { %2230 = vst.msk [vmem:[#allocation4] sm:$0xff] %vm2229_vm2, %v2228_v61 }
 0x759   : > { %v2237_v62 = vld [vmem:[#allocation4] sm:$0xff] }
 0x75a   : > { %3205 = vlog2.f32 %v2237_v62 }
 0x764   : > { %v3206_v1 = vpop.eup %3205 }
 0x765   : > { %v2239_v46 = vmul.f32 0.6931472, %v3206_v1 }
 0x767   : > { %v2240_v49 = vadd.f32 %v2239_v46, %v2236_v3 }
 0x769   : > { %2241 = vst.msk [vmem:[%s4457_s11] sm:$0xff] %vm2229_vm2, %v2240_v49 }
 0x76a PF: > { %s28_s18 = sadd.s32 1, %s3529_s18   ;;  %s4458_s10 = sld [smem:[#allocation27_spill]] }
 0x76b   : > { %p25_p11 = scmp.ge.s32.totalorder %s28_s18, 11   ;;  %s4459_s9 = sld [smem:[#allocation26_spill]] }
 0x76c   : > { %s4460_s13 = smov %s3513_s14  ;;  %s4461_s14 = smov %s3517_s15 }
 0x76d   : > { %s4463_s16 = smov %s3525_s17  ;;  %27 = sbr.rel (!%p25_p11) target bundleno = 15 (0xf), region = 157 }
 0x770   : > { %s4462_s15 = smov %s4458_s10 }
 0x771   : > { %s4464_s17 = smov %s4459_s9 }
 0x774   :  { %2286 = vsyncpa [#allocation6], 1 }
 0x775   :  { %2288 = vsyncpa [#allocation6 + $0x1], 1 }
 0x776   :  { %2289 = vsyncpa [#allocation8], 1 }
 0x777   :  { %2290 = vsyncpa [#allocation11], 1 }
 0x778   :  { %2291 = vsyncpa [#allocation14], 1 }
 0x779   :  { %2292 = vsyncpa [#allocation17], 1 }
 0x77a   :  { %2294 = vsyncpa [#allocation17 + $0x1], 1 }

</bundles_post_ra>
